<compile_context>
chip_gen: v6e
topology: v6e:2x2x1
jax: 0.10.0
libtpu: 0.0.40
codegen_flags: <defaults>
</compile_context>

<pallas_src>
import functools

import jax
import jax.numpy as jnp
from jax.experimental import pallas as pl
from jax.experimental.pallas import tpu as pltpu

# MXU operand dtype (accumulation is always f32 via preferred_element_type).
# Set to jnp.float32 for bit-exact f32 matmuls vs. the PyTorch reference.
MATMUL_DTYPE = jnp.bfloat16


def _fused_lstm_kernel(*refs, hidden, num_layers):
    """refs = (x, [w_ih, w_hh, bias] * L, dense_w, dense_b, out)."""
    x_ref = refs[0]
    layer_refs = [
        (refs[1 + 3 * l], refs[2 + 3 * l], refs[3 + 3 * l])
        for l in range(num_layers)
    ]
    dense_w_ref = refs[1 + 3 * num_layers]
    dense_b_ref = refs[2 + 3 * num_layers]          # SMEM (1, 1) f32 scalar
    out_ref = refs[3 + 3 * num_layers]

    H = hidden
    B, T, I = x_ref.shape

    # ---- Layer 0 input projection: one batched MXU matmul over ALL
    # timesteps (M = B*T instead of T pushes with M = B). Bias folded here.
    w_ih0_ref, _, b0_ref = layer_refs[0]
    w_ih0 = w_ih0_ref[...]                          # (I, 4H)  MATMUL_DTYPE
    b0 = b0_ref[...]                                # (1, 4H)  f32
    x = x_ref[...]                                  # (B, T, I) f32
    gx_flat = jnp.dot(
        x.reshape(B * T, I).astype(w_ih0.dtype), w_ih0,
        preferred_element_type=jnp.float32,
    ) + b0                                          # (B*T, 4H) f32
    gx_all = gx_flat.reshape(B, T, 4 * H)
    # Per-timestep input projections kept as values in vregs (no VMEM scratch).
    gx = [gx_all[:, t, :] for t in range(T)]        # T x (B, 4H)

    h = None
    for layer in range(num_layers):
        _, w_hh_ref, _ = layer_refs[layer]
        w_hh = w_hh_ref[...]                        # (H, 4H)  MATMUL_DTYPE
        is_last = layer == num_layers - 1
        if not is_last:
            w_ih_next = layer_refs[layer + 1][0][...]   # (H, 4H)
            b_next = layer_refs[layer + 1][2][...]      # (1, 4H)
            gx_next = []

        h = jnp.zeros((B, H), jnp.float32)
        c = jnp.zeros((B, H), jnp.float32)
        # Fully-unrolled recurrence: only h @ W_hh is sequentially dependent.
        for t in range(T):
            gates = jnp.dot(
                h.astype(w_hh.dtype), w_hh,
                preferred_element_type=jnp.float32,
            ) + gx[t]                               # (B, 4H) f32
            # Activate the full gate vector once (EUP has slack), then take
            # PyTorch-ordered [i, f, g, o] lane slices of the results.
            sig = jax.nn.sigmoid(gates)
            tnh = jnp.tanh(gates)
            i_g = sig[:, 0 * H:1 * H]
            f_g = sig[:, 1 * H:2 * H]
            g_g = tnh[:, 2 * H:3 * H]
            o_g = sig[:, 3 * H:4 * H]
            c = f_g * c + i_g * g_g
            h = o_g * jnp.tanh(c)
            if not is_last:
                # Fuse the NEXT layer's input projection under this layer's
                # serial chain (independent work, hides under MXU/EUP idle).
                gx_next.append(
                    jnp.dot(h.astype(w_ih_next.dtype), w_ih_next,
                            preferred_element_type=jnp.float32) + b_next
                )
        if not is_last:
            gx = gx_next

    # ---- Dense head on the last timestep of the last layer: lane-wise
    # multiply + cross-lane reduce (no degenerate (H, 1) matmul); scalar
    # bias comes from SMEM.
    out = jnp.sum(h * dense_w_ref[...], axis=-1, keepdims=True) + dense_b_ref[0, 0]
    out_ref[...] = out.astype(out_ref.dtype)


def lstm_model_forward(params, x, hidden_size):
    """x: (B, T, I) batch_first, like the PyTorch module.  Returns (B, 1)."""
    B, T, I = x.shape
    H = hidden_size
    L = len(params["layers"])

    inputs = [x]
    in_specs = [pl.BlockSpec((B, T, I), lambda: (0, 0, 0))]
    for lp in params["layers"]:
        inputs += [lp["w_ih"], lp["w_hh"], lp["bias"]]
        in_specs += [
            pl.BlockSpec(lp["w_ih"].shape, lambda: (0, 0)),
            pl.BlockSpec(lp["w_hh"].shape, lambda: (0, 0)),
            pl.BlockSpec(lp["bias"].shape, lambda: (0, 0)),
        ]
    inputs += [params["dense_w"], params["dense_b"]]
    in_specs += [
        pl.BlockSpec((1, H), lambda: (0, 0)),
        pl.BlockSpec(memory_space=pltpu.MemorySpace.SMEM),   # scalar bias
    ]

    kernel = functools.partial(_fused_lstm_kernel, hidden=H, num_layers=L)
    return pl.pallas_call(
        kernel,
        out_shape=jax.ShapeDtypeStruct((B, 1), jnp.float32),
        in_specs=in_specs,
        out_specs=pl.BlockSpec((B, 1), lambda: (0, 0)),
    )(*inputs)


def init_params(key, input_size, hidden_size, num_layers):
    """Deterministic init matching PyTorch LSTM/Linear param shapes.

    Weights are stored pre-transposed for right-multiplication and pre-cast
    to the MXU dtype (no per-call casts):
      w_ih: (in, 4H) MATMUL_DTYPE, w_hh: (H, 4H) MATMUL_DTYPE,
      bias: (1, 4H) f32 = b_ih + b_hh combined,
      dense_w: (1, H) f32 row vector (used as multiply+reduce),
      dense_b: (1, 1) f32 (SMEM scalar).
    """
    params = {"layers": []}
    k = 1.0 / float(hidden_size) ** 0.5
    for layer in range(num_layers):
        in_dim = input_size if layer == 0 else hidden_size
        key, k1, k2, k3, k4 = jax.random.split(key, 5)
        w_ih = jax.random.uniform(k1, (in_dim, 4 * hidden_size), jnp.float32, -k, k)
        w_hh = jax.random.uniform(k2, (hidden_size, 4 * hidden_size), jnp.float32, -k, k)
        b_ih = jax.random.uniform(k3, (4 * hidden_size,), jnp.float32, -k, k)
        b_hh = jax.random.uniform(k4, (4 * hidden_size,), jnp.float32, -k, k)
        params["layers"].append(
            dict(
                w_ih=w_ih.astype(MATMUL_DTYPE),
                w_hh=w_hh.astype(MATMUL_DTYPE),
                bias=(b_ih + b_hh).reshape(1, 4 * hidden_size),
            )
        )
    key, k5, k6 = jax.random.split(key, 3)
    params["dense_w"] = jax.random.uniform(k5, (1, hidden_size), jnp.float32, -k, k)
    params["dense_b"] = jax.random.uniform(k6, (1, 1), jnp.float32, -k, k)
    return params


if __name__ == "__main__":
    batch, seq, input_size, hidden_size, num_layers = 2, 8, 4, 32, 2

    key = jax.random.PRNGKey(0)
    k_x, k_p = jax.random.split(key)
    x = jax.random.normal(k_x, (batch, seq, input_size), jnp.float32)
    params = init_params(k_p, input_size, hidden_size, num_layers)

    out = lstm_model_forward(params, x, hidden_size)
    jax.block_until_ready(out)
    assert out.shape == (batch, 1)
    print("KERNEL_OK")
</pallas_src>

<mosaic_0001>
module attributes {stable_mosaic.version = 11 : i64} {
  func.func @_fused_lstm_kernel(%arg0: memref<2x8x4xf32, #tpu.memory_space<vmem>>, %arg1: memref<4x128xbf16, #tpu.memory_space<vmem>>, %arg2: memref<32x128xbf16, #tpu.memory_space<vmem>>, %arg3: memref<1x128xf32, #tpu.memory_space<vmem>>, %arg4: memref<32x128xbf16, #tpu.memory_space<vmem>>, %arg5: memref<32x128xbf16, #tpu.memory_space<vmem>>, %arg6: memref<1x128xf32, #tpu.memory_space<vmem>>, %arg7: memref<1x32xf32, #tpu.memory_space<vmem>>, %arg8: memref<1x1xf32, #tpu.memory_space<smem>>, %arg9: memref<2x1xf32, #tpu.memory_space<vmem>>) attributes {dimension_semantics = [], scalar_prefetch = 0 : i64, scratch_operands = 0 : i64, tpu.core_type = #tpu.core_type<tc>} {
    %c0 = arith.constant 0 : index
    %c0_0 = arith.constant 0 : index
    %0 = vector.load %arg1[%c0, %c0_0] : memref<4x128xbf16, #tpu.memory_space<vmem>>, vector<4x128xbf16>
    %c0_1 = arith.constant 0 : index
    %c0_2 = arith.constant 0 : index
    %1 = vector.load %arg3[%c0_1, %c0_2] : memref<1x128xf32, #tpu.memory_space<vmem>>, vector<1x128xf32>
    %c0_3 = arith.constant 0 : index
    %c0_4 = arith.constant 0 : index
    %c0_5 = arith.constant 0 : index
    %2 = vector.load %arg0[%c0_3, %c0_4, %c0_5] : memref<2x8x4xf32, #tpu.memory_space<vmem>>, vector<2x8x4xf32>
    %3 = vector.shape_cast %2 : vector<2x8x4xf32> to vector<16x4xf32>
    %4 = arith.truncf %3 : vector<16x4xf32> to vector<16x4xbf16>
    %cst = arith.constant dense<0.000000e+00> : vector<16x128xf32>
    %5 = tpu.matmul %4, %0, %cst {dimension_numbers = #tpu.dot_dimension_numbers<[1], [0], [0], [1], [0, 0, 1, 1], [], []>} : vector<16x4xbf16>, vector<4x128xbf16>, vector<16x128xf32> -> vector<16x128xf32>
    %6 = vector.broadcast %1 : vector<1x128xf32> to vector<16x128xf32>
    %7 = arith.addf %5, %6 : vector<16x128xf32>
    %8 = vector.shape_cast %7 : vector<16x128xf32> to vector<2x8x128xf32>
    %9 = vector.extract_strided_slice %8 {offsets = [0, 0, 0], sizes = [2, 1, 128], strides = [1, 1, 1]} : vector<2x8x128xf32> to vector<2x1x128xf32>
    %10 = vector.shape_cast %9 : vector<2x1x128xf32> to vector<2x128xf32>
    %11 = vector.extract_strided_slice %8 {offsets = [0, 1, 0], sizes = [2, 1, 128], strides = [1, 1, 1]} : vector<2x8x128xf32> to vector<2x1x128xf32>
    %12 = vector.shape_cast %11 : vector<2x1x128xf32> to vector<2x128xf32>
    %13 = vector.extract_strided_slice %8 {offsets = [0, 2, 0], sizes = [2, 1, 128], strides = [1, 1, 1]} : vector<2x8x128xf32> to vector<2x1x128xf32>
    %14 = vector.shape_cast %13 : vector<2x1x128xf32> to vector<2x128xf32>
    %15 = vector.extract_strided_slice %8 {offsets = [0, 3, 0], sizes = [2, 1, 128], strides = [1, 1, 1]} : vector<2x8x128xf32> to vector<2x1x128xf32>
    %16 = vector.shape_cast %15 : vector<2x1x128xf32> to vector<2x128xf32>
    %17 = vector.extract_strided_slice %8 {offsets = [0, 4, 0], sizes = [2, 1, 128], strides = [1, 1, 1]} : vector<2x8x128xf32> to vector<2x1x128xf32>
    %18 = vector.shape_cast %17 : vector<2x1x128xf32> to vector<2x128xf32>
    %19 = vector.extract_strided_slice %8 {offsets = [0, 5, 0], sizes = [2, 1, 128], strides = [1, 1, 1]} : vector<2x8x128xf32> to vector<2x1x128xf32>
    %20 = vector.shape_cast %19 : vector<2x1x128xf32> to vector<2x128xf32>
    %21 = vector.extract_strided_slice %8 {offsets = [0, 6, 0], sizes = [2, 1, 128], strides = [1, 1, 1]} : vector<2x8x128xf32> to vector<2x1x128xf32>
    %22 = vector.shape_cast %21 : vector<2x1x128xf32> to vector<2x128xf32>
    %23 = vector.extract_strided_slice %8 {offsets = [0, 7, 0], sizes = [2, 1, 128], strides = [1, 1, 1]} : vector<2x8x128xf32> to vector<2x1x128xf32>
    %24 = vector.shape_cast %23 : vector<2x1x128xf32> to vector<2x128xf32>
    %c0_6 = arith.constant 0 : index
    %c0_7 = arith.constant 0 : index
    %25 = vector.load %arg2[%c0_6, %c0_7] : memref<32x128xbf16, #tpu.memory_space<vmem>>, vector<32x128xbf16>
    %c0_8 = arith.constant 0 : index
    %c0_9 = arith.constant 0 : index
    %26 = vector.load %arg4[%c0_8, %c0_9] : memref<32x128xbf16, #tpu.memory_space<vmem>>, vector<32x128xbf16>
    %c0_10 = arith.constant 0 : index
    %c0_11 = arith.constant 0 : index
    %27 = vector.load %arg6[%c0_10, %c0_11] : memref<1x128xf32, #tpu.memory_space<vmem>>, vector<1x128xf32>
    %cst_12 = arith.constant 0.000000e+00 : f32
    %28 = vector.broadcast %cst_12 : f32 to vector<2x32xf32>
    %cst_13 = arith.constant 0.000000e+00 : f32
    %29 = vector.broadcast %cst_13 : f32 to vector<2x32xf32>
    %30 = arith.truncf %28 : vector<2x32xf32> to vector<2x32xbf16>
    %cst_14 = arith.constant dense<0.000000e+00> : vector<2x128xf32>
    %31 = tpu.matmul %30, %25, %cst_14 {dimension_numbers = #tpu.dot_dimension_numbers<[1], [0], [0], [1], [0, 0, 1, 1], [], []>} : vector<2x32xbf16>, vector<32x128xbf16>, vector<2x128xf32> -> vector<2x128xf32>
    %32 = arith.addf %31, %10 : vector<2x128xf32>
    %33 = arith.negf %32 : vector<2x128xf32>
    %34 = math.exp %33 : vector<2x128xf32>
    %cst_15 = arith.constant 1.000000e+00 : f32
    %35 = vector.broadcast %cst_15 : f32 to vector<2x128xf32>
    %36 = arith.addf %35, %34 : vector<2x128xf32>
    %37 = arith.divf %35, %36 : vector<2x128xf32>
    %38 = math.tanh %32 : vector<2x128xf32>
    %39 = vector.extract_strided_slice %37 {offsets = [0, 0], sizes = [2, 32], strides = [1, 1]} : vector<2x128xf32> to vector<2x32xf32>
    %40 = vector.extract_strided_slice %37 {offsets = [0, 32], sizes = [2, 32], strides = [1, 1]} : vector<2x128xf32> to vector<2x32xf32>
    %41 = vector.extract_strided_slice %38 {offsets = [0, 64], sizes = [2, 32], strides = [1, 1]} : vector<2x128xf32> to vector<2x32xf32>
    %42 = vector.extract_strided_slice %37 {offsets = [0, 96], sizes = [2, 32], strides = [1, 1]} : vector<2x128xf32> to vector<2x32xf32>
    %43 = arith.mulf %40, %29 : vector<2x32xf32>
    %44 = arith.mulf %39, %41 : vector<2x32xf32>
    %45 = arith.addf %43, %44 : vector<2x32xf32>
    %46 = math.tanh %45 : vector<2x32xf32>
    %47 = arith.mulf %42, %46 : vector<2x32xf32>
    %48 = arith.truncf %47 : vector<2x32xf32> to vector<2x32xbf16>
    %cst_16 = arith.constant dense<0.000000e+00> : vector<2x128xf32>
    %49 = tpu.matmul %48, %26, %cst_16 {dimension_numbers = #tpu.dot_dimension_numbers<[1], [0], [0], [1], [0, 0, 1, 1], [], []>} : vector<2x32xbf16>, vector<32x128xbf16>, vector<2x128xf32> -> vector<2x128xf32>
    %50 = vector.broadcast %27 : vector<1x128xf32> to vector<2x128xf32>
    %51 = arith.addf %49, %50 : vector<2x128xf32>
    %52 = arith.truncf %47 : vector<2x32xf32> to vector<2x32xbf16>
    %cst_17 = arith.constant dense<0.000000e+00> : vector<2x128xf32>
    %53 = tpu.matmul %52, %25, %cst_17 {dimension_numbers = #tpu.dot_dimension_numbers<[1], [0], [0], [1], [0, 0, 1, 1], [], []>} : vector<2x32xbf16>, vector<32x128xbf16>, vector<2x128xf32> -> vector<2x128xf32>
    %54 = arith.addf %53, %12 : vector<2x128xf32>
    %55 = arith.negf %54 : vector<2x128xf32>
    %56 = math.exp %55 : vector<2x128xf32>
    %cst_18 = arith.constant 1.000000e+00 : f32
    %57 = vector.broadcast %cst_18 : f32 to vector<2x128xf32>
    %58 = arith.addf %57, %56 : vector<2x128xf32>
    %59 = arith.divf %57, %58 : vector<2x128xf32>
    %60 = math.tanh %54 : vector<2x128xf32>
    %61 = vector.extract_strided_slice %59 {offsets = [0, 0], sizes = [2, 32], strides = [1, 1]} : vector<2x128xf32> to vector<2x32xf32>
    %62 = vector.extract_strided_slice %59 {offsets = [0, 32], sizes = [2, 32], strides = [1, 1]} : vector<2x128xf32> to vector<2x32xf32>
    %63 = vector.extract_strided_slice %60 {offsets = [0, 64], sizes = [2, 32], strides = [1, 1]} : vector<2x128xf32> to vector<2x32xf32>
    %64 = vector.extract_strided_slice %59 {offsets = [0, 96], sizes = [2, 32], strides = [1, 1]} : vector<2x128xf32> to vector<2x32xf32>
    %65 = arith.mulf %62, %45 : vector<2x32xf32>
    %66 = arith.mulf %61, %63 : vector<2x32xf32>
    %67 = arith.addf %65, %66 : vector<2x32xf32>
    %68 = math.tanh %67 : vector<2x32xf32>
    %69 = arith.mulf %64, %68 : vector<2x32xf32>
    %70 = arith.truncf %69 : vector<2x32xf32> to vector<2x32xbf16>
    %cst_19 = arith.constant dense<0.000000e+00> : vector<2x128xf32>
    %71 = tpu.matmul %70, %26, %cst_19 {dimension_numbers = #tpu.dot_dimension_numbers<[1], [0], [0], [1], [0, 0, 1, 1], [], []>} : vector<2x32xbf16>, vector<32x128xbf16>, vector<2x128xf32> -> vector<2x128xf32>
    %72 = vector.broadcast %27 : vector<1x128xf32> to vector<2x128xf32>
    %73 = arith.addf %71, %72 : vector<2x128xf32>
    %74 = arith.truncf %69 : vector<2x32xf32> to vector<2x32xbf16>
    %cst_20 = arith.constant dense<0.000000e+00> : vector<2x128xf32>
    %75 = tpu.matmul %74, %25, %cst_20 {dimension_numbers = #tpu.dot_dimension_numbers<[1], [0], [0], [1], [0, 0, 1, 1], [], []>} : vector<2x32xbf16>, vector<32x128xbf16>, vector<2x128xf32> -> vector<2x128xf32>
    %76 = arith.addf %75, %14 : vector<2x128xf32>
    %77 = arith.negf %76 : vector<2x128xf32>
    %78 = math.exp %77 : vector<2x128xf32>
    %cst_21 = arith.constant 1.000000e+00 : f32
    %79 = vector.broadcast %cst_21 : f32 to vector<2x128xf32>
    %80 = arith.addf %79, %78 : vector<2x128xf32>
    %81 = arith.divf %79, %80 : vector<2x128xf32>
    %82 = math.tanh %76 : vector<2x128xf32>
    %83 = vector.extract_strided_slice %81 {offsets = [0, 0], sizes = [2, 32], strides = [1, 1]} : vector<2x128xf32> to vector<2x32xf32>
    %84 = vector.extract_strided_slice %81 {offsets = [0, 32], sizes = [2, 32], strides = [1, 1]} : vector<2x128xf32> to vector<2x32xf32>
    %85 = vector.extract_strided_slice %82 {offsets = [0, 64], sizes = [2, 32], strides = [1, 1]} : vector<2x128xf32> to vector<2x32xf32>
    %86 = vector.extract_strided_slice %81 {offsets = [0, 96], sizes = [2, 32], strides = [1, 1]} : vector<2x128xf32> to vector<2x32xf32>
    %87 = arith.mulf %84, %67 : vector<2x32xf32>
    %88 = arith.mulf %83, %85 : vector<2x32xf32>
    %89 = arith.addf %87, %88 : vector<2x32xf32>
    %90 = math.tanh %89 : vector<2x32xf32>
    %91 = arith.mulf %86, %90 : vector<2x32xf32>
    %92 = arith.truncf %91 : vector<2x32xf32> to vector<2x32xbf16>
    %cst_22 = arith.constant dense<0.000000e+00> : vector<2x128xf32>
    %93 = tpu.matmul %92, %26, %cst_22 {dimension_numbers = #tpu.dot_dimension_numbers<[1], [0], [0], [1], [0, 0, 1, 1], [], []>} : vector<2x32xbf16>, vector<32x128xbf16>, vector<2x128xf32> -> vector<2x128xf32>
    %94 = vector.broadcast %27 : vector<1x128xf32> to vector<2x128xf32>
    %95 = arith.addf %93, %94 : vector<2x128xf32>
    %96 = arith.truncf %91 : vector<2x32xf32> to vector<2x32xbf16>
    %cst_23 = arith.constant dense<0.000000e+00> : vector<2x128xf32>
    %97 = tpu.matmul %96, %25, %cst_23 {dimension_numbers = #tpu.dot_dimension_numbers<[1], [0], [0], [1], [0, 0, 1, 1], [], []>} : vector<2x32xbf16>, vector<32x128xbf16>, vector<2x128xf32> -> vector<2x128xf32>
    %98 = arith.addf %97, %16 : vector<2x128xf32>
    %99 = arith.negf %98 : vector<2x128xf32>
    %100 = math.exp %99 : vector<2x128xf32>
    %cst_24 = arith.constant 1.000000e+00 : f32
    %101 = vector.broadcast %cst_24 : f32 to vector<2x128xf32>
    %102 = arith.addf %101, %100 : vector<2x128xf32>
    %103 = arith.divf %101, %102 : vector<2x128xf32>
    %104 = math.tanh %98 : vector<2x128xf32>
    %105 = vector.extract_strided_slice %103 {offsets = [0, 0], sizes = [2, 32], strides = [1, 1]} : vector<2x128xf32> to vector<2x32xf32>
    %106 = vector.extract_strided_slice %103 {offsets = [0, 32], sizes = [2, 32], strides = [1, 1]} : vector<2x128xf32> to vector<2x32xf32>
    %107 = vector.extract_strided_slice %104 {offsets = [0, 64], sizes = [2, 32], strides = [1, 1]} : vector<2x128xf32> to vector<2x32xf32>
    %108 = vector.extract_strided_slice %103 {offsets = [0, 96], sizes = [2, 32], strides = [1, 1]} : vector<2x128xf32> to vector<2x32xf32>
    %109 = arith.mulf %106, %89 : vector<2x32xf32>
    %110 = arith.mulf %105, %107 : vector<2x32xf32>
    %111 = arith.addf %109, %110 : vector<2x32xf32>
    %112 = math.tanh %111 : vector<2x32xf32>
    %113 = arith.mulf %108, %112 : vector<2x32xf32>
    %114 = arith.truncf %113 : vector<2x32xf32> to vector<2x32xbf16>
    %cst_25 = arith.constant dense<0.000000e+00> : vector<2x128xf32>
    %115 = tpu.matmul %114, %26, %cst_25 {dimension_numbers = #tpu.dot_dimension_numbers<[1], [0], [0], [1], [0, 0, 1, 1], [], []>} : vector<2x32xbf16>, vector<32x128xbf16>, vector<2x128xf32> -> vector<2x128xf32>
    %116 = vector.broadcast %27 : vector<1x128xf32> to vector<2x128xf32>
    %117 = arith.addf %115, %116 : vector<2x128xf32>
    %118 = arith.truncf %113 : vector<2x32xf32> to vector<2x32xbf16>
    %cst_26 = arith.constant dense<0.000000e+00> : vector<2x128xf32>
    %119 = tpu.matmul %118, %25, %cst_26 {dimension_numbers = #tpu.dot_dimension_numbers<[1], [0], [0], [1], [0, 0, 1, 1], [], []>} : vector<2x32xbf16>, vector<32x128xbf16>, vector<2x128xf32> -> vector<2x128xf32>
    %120 = arith.addf %119, %18 : vector<2x128xf32>
    %121 = arith.negf %120 : vector<2x128xf32>
    %122 = math.exp %121 : vector<2x128xf32>
    %cst_27 = arith.constant 1.000000e+00 : f32
    %123 = vector.broadcast %cst_27 : f32 to vector<2x128xf32>
    %124 = arith.addf %123, %122 : vector<2x128xf32>
    %125 = arith.divf %123, %124 : vector<2x128xf32>
    %126 = math.tanh %120 : vector<2x128xf32>
    %127 = vector.extract_strided_slice %125 {offsets = [0, 0], sizes = [2, 32], strides = [1, 1]} : vector<2x128xf32> to vector<2x32xf32>
    %128 = vector.extract_strided_slice %125 {offsets = [0, 32], sizes = [2, 32], strides = [1, 1]} : vector<2x128xf32> to vector<2x32xf32>
    %129 = vector.extract_strided_slice %126 {offsets = [0, 64], sizes = [2, 32], strides = [1, 1]} : vector<2x128xf32> to vector<2x32xf32>
    %130 = vector.extract_strided_slice %125 {offsets = [0, 96], sizes = [2, 32], strides = [1, 1]} : vector<2x128xf32> to vector<2x32xf32>
    %131 = arith.mulf %128, %111 : vector<2x32xf32>
    %132 = arith.mulf %127, %129 : vector<2x32xf32>
    %133 = arith.addf %131, %132 : vector<2x32xf32>
    %134 = math.tanh %133 : vector<2x32xf32>
    %135 = arith.mulf %130, %134 : vector<2x32xf32>
    %136 = arith.truncf %135 : vector<2x32xf32> to vector<2x32xbf16>
    %cst_28 = arith.constant dense<0.000000e+00> : vector<2x128xf32>
    %137 = tpu.matmul %136, %26, %cst_28 {dimension_numbers = #tpu.dot_dimension_numbers<[1], [0], [0], [1], [0, 0, 1, 1], [], []>} : vector<2x32xbf16>, vector<32x128xbf16>, vector<2x128xf32> -> vector<2x128xf32>
    %138 = vector.broadcast %27 : vector<1x128xf32> to vector<2x128xf32>
    %139 = arith.addf %137, %138 : vector<2x128xf32>
    %140 = arith.truncf %135 : vector<2x32xf32> to vector<2x32xbf16>
    %cst_29 = arith.constant dense<0.000000e+00> : vector<2x128xf32>
    %141 = tpu.matmul %140, %25, %cst_29 {dimension_numbers = #tpu.dot_dimension_numbers<[1], [0], [0], [1], [0, 0, 1, 1], [], []>} : vector<2x32xbf16>, vector<32x128xbf16>, vector<2x128xf32> -> vector<2x128xf32>
    %142 = arith.addf %141, %20 : vector<2x128xf32>
    %143 = arith.negf %142 : vector<2x128xf32>
    %144 = math.exp %143 : vector<2x128xf32>
    %cst_30 = arith.constant 1.000000e+00 : f32
    %145 = vector.broadcast %cst_30 : f32 to vector<2x128xf32>
    %146 = arith.addf %145, %144 : vector<2x128xf32>
    %147 = arith.divf %145, %146 : vector<2x128xf32>
    %148 = math.tanh %142 : vector<2x128xf32>
    %149 = vector.extract_strided_slice %147 {offsets = [0, 0], sizes = [2, 32], strides = [1, 1]} : vector<2x128xf32> to vector<2x32xf32>
    %150 = vector.extract_strided_slice %147 {offsets = [0, 32], sizes = [2, 32], strides = [1, 1]} : vector<2x128xf32> to vector<2x32xf32>
    %151 = vector.extract_strided_slice %148 {offsets = [0, 64], sizes = [2, 32], strides = [1, 1]} : vector<2x128xf32> to vector<2x32xf32>
    %152 = vector.extract_strided_slice %147 {offsets = [0, 96], sizes = [2, 32], strides = [1, 1]} : vector<2x128xf32> to vector<2x32xf32>
    %153 = arith.mulf %150, %133 : vector<2x32xf32>
    %154 = arith.mulf %149, %151 : vector<2x32xf32>
    %155 = arith.addf %153, %154 : vector<2x32xf32>
    %156 = math.tanh %155 : vector<2x32xf32>
    %157 = arith.mulf %152, %156 : vector<2x32xf32>
    %158 = arith.truncf %157 : vector<2x32xf32> to vector<2x32xbf16>
    %cst_31 = arith.constant dense<0.000000e+00> : vector<2x128xf32>
    %159 = tpu.matmul %158, %26, %cst_31 {dimension_numbers = #tpu.dot_dimension_numbers<[1], [0], [0], [1], [0, 0, 1, 1], [], []>} : vector<2x32xbf16>, vector<32x128xbf16>, vector<2x128xf32> -> vector<2x128xf32>
    %160 = vector.broadcast %27 : vector<1x128xf32> to vector<2x128xf32>
    %161 = arith.addf %159, %160 : vector<2x128xf32>
    %162 = arith.truncf %157 : vector<2x32xf32> to vector<2x32xbf16>
    %cst_32 = arith.constant dense<0.000000e+00> : vector<2x128xf32>
    %163 = tpu.matmul %162, %25, %cst_32 {dimension_numbers = #tpu.dot_dimension_numbers<[1], [0], [0], [1], [0, 0, 1, 1], [], []>} : vector<2x32xbf16>, vector<32x128xbf16>, vector<2x128xf32> -> vector<2x128xf32>
    %164 = arith.addf %163, %22 : vector<2x128xf32>
    %165 = arith.negf %164 : vector<2x128xf32>
    %166 = math.exp %165 : vector<2x128xf32>
    %cst_33 = arith.constant 1.000000e+00 : f32
    %167 = vector.broadcast %cst_33 : f32 to vector<2x128xf32>
    %168 = arith.addf %167, %166 : vector<2x128xf32>
    %169 = arith.divf %167, %168 : vector<2x128xf32>
    %170 = math.tanh %164 : vector<2x128xf32>
    %171 = vector.extract_strided_slice %169 {offsets = [0, 0], sizes = [2, 32], strides = [1, 1]} : vector<2x128xf32> to vector<2x32xf32>
    %172 = vector.extract_strided_slice %169 {offsets = [0, 32], sizes = [2, 32], strides = [1, 1]} : vector<2x128xf32> to vector<2x32xf32>
    %173 = vector.extract_strided_slice %170 {offsets = [0, 64], sizes = [2, 32], strides = [1, 1]} : vector<2x128xf32> to vector<2x32xf32>
    %174 = vector.extract_strided_slice %169 {offsets = [0, 96], sizes = [2, 32], strides = [1, 1]} : vector<2x128xf32> to vector<2x32xf32>
    %175 = arith.mulf %172, %155 : vector<2x32xf32>
    %176 = arith.mulf %171, %173 : vector<2x32xf32>
    %177 = arith.addf %175, %176 : vector<2x32xf32>
    %178 = math.tanh %177 : vector<2x32xf32>
    %179 = arith.mulf %174, %178 : vector<2x32xf32>
    %180 = arith.truncf %179 : vector<2x32xf32> to vector<2x32xbf16>
    %cst_34 = arith.constant dense<0.000000e+00> : vector<2x128xf32>
    %181 = tpu.matmul %180, %26, %cst_34 {dimension_numbers = #tpu.dot_dimension_numbers<[1], [0], [0], [1], [0, 0, 1, 1], [], []>} : vector<2x32xbf16>, vector<32x128xbf16>, vector<2x128xf32> -> vector<2x128xf32>
    %182 = vector.broadcast %27 : vector<1x128xf32> to vector<2x128xf32>
    %183 = arith.addf %181, %182 : vector<2x128xf32>
    %184 = arith.truncf %179 : vector<2x32xf32> to vector<2x32xbf16>
    %cst_35 = arith.constant dense<0.000000e+00> : vector<2x128xf32>
    %185 = tpu.matmul %184, %25, %cst_35 {dimension_numbers = #tpu.dot_dimension_numbers<[1], [0], [0], [1], [0, 0, 1, 1], [], []>} : vector<2x32xbf16>, vector<32x128xbf16>, vector<2x128xf32> -> vector<2x128xf32>
    %186 = arith.addf %185, %24 : vector<2x128xf32>
    %187 = arith.negf %186 : vector<2x128xf32>
    %188 = math.exp %187 : vector<2x128xf32>
    %cst_36 = arith.constant 1.000000e+00 : f32
    %189 = vector.broadcast %cst_36 : f32 to vector<2x128xf32>
    %190 = arith.addf %189, %188 : vector<2x128xf32>
    %191 = arith.divf %189, %190 : vector<2x128xf32>
    %192 = math.tanh %186 : vector<2x128xf32>
    %193 = vector.extract_strided_slice %191 {offsets = [0, 0], sizes = [2, 32], strides = [1, 1]} : vector<2x128xf32> to vector<2x32xf32>
    %194 = vector.extract_strided_slice %191 {offsets = [0, 32], sizes = [2, 32], strides = [1, 1]} : vector<2x128xf32> to vector<2x32xf32>
    %195 = vector.extract_strided_slice %192 {offsets = [0, 64], sizes = [2, 32], strides = [1, 1]} : vector<2x128xf32> to vector<2x32xf32>
    %196 = vector.extract_strided_slice %191 {offsets = [0, 96], sizes = [2, 32], strides = [1, 1]} : vector<2x128xf32> to vector<2x32xf32>
    %197 = arith.mulf %194, %177 : vector<2x32xf32>
    %198 = arith.mulf %193, %195 : vector<2x32xf32>
    %199 = arith.addf %197, %198 : vector<2x32xf32>
    %200 = math.tanh %199 : vector<2x32xf32>
    %201 = arith.mulf %196, %200 : vector<2x32xf32>
    %202 = arith.truncf %201 : vector<2x32xf32> to vector<2x32xbf16>
    %cst_37 = arith.constant dense<0.000000e+00> : vector<2x128xf32>
    %203 = tpu.matmul %202, %26, %cst_37 {dimension_numbers = #tpu.dot_dimension_numbers<[1], [0], [0], [1], [0, 0, 1, 1], [], []>} : vector<2x32xbf16>, vector<32x128xbf16>, vector<2x128xf32> -> vector<2x128xf32>
    %204 = vector.broadcast %27 : vector<1x128xf32> to vector<2x128xf32>
    %205 = arith.addf %203, %204 : vector<2x128xf32>
    %c0_38 = arith.constant 0 : index
    %c0_39 = arith.constant 0 : index
    %206 = vector.load %arg5[%c0_38, %c0_39] : memref<32x128xbf16, #tpu.memory_space<vmem>>, vector<32x128xbf16>
    %cst_40 = arith.constant 0.000000e+00 : f32
    %207 = vector.broadcast %cst_40 : f32 to vector<2x32xf32>
    %cst_41 = arith.constant 0.000000e+00 : f32
    %208 = vector.broadcast %cst_41 : f32 to vector<2x32xf32>
    %209 = arith.truncf %207 : vector<2x32xf32> to vector<2x32xbf16>
    %cst_42 = arith.constant dense<0.000000e+00> : vector<2x128xf32>
    %210 = tpu.matmul %209, %206, %cst_42 {dimension_numbers = #tpu.dot_dimension_numbers<[1], [0], [0], [1], [0, 0, 1, 1], [], []>} : vector<2x32xbf16>, vector<32x128xbf16>, vector<2x128xf32> -> vector<2x128xf32>
    %211 = arith.addf %210, %51 : vector<2x128xf32>
    %212 = arith.negf %211 : vector<2x128xf32>
    %213 = math.exp %212 : vector<2x128xf32>
    %cst_43 = arith.constant 1.000000e+00 : f32
    %214 = vector.broadcast %cst_43 : f32 to vector<2x128xf32>
    %215 = arith.addf %214, %213 : vector<2x128xf32>
    %216 = arith.divf %214, %215 : vector<2x128xf32>
    %217 = math.tanh %211 : vector<2x128xf32>
    %218 = vector.extract_strided_slice %216 {offsets = [0, 0], sizes = [2, 32], strides = [1, 1]} : vector<2x128xf32> to vector<2x32xf32>
    %219 = vector.extract_strided_slice %216 {offsets = [0, 32], sizes = [2, 32], strides = [1, 1]} : vector<2x128xf32> to vector<2x32xf32>
    %220 = vector.extract_strided_slice %217 {offsets = [0, 64], sizes = [2, 32], strides = [1, 1]} : vector<2x128xf32> to vector<2x32xf32>
    %221 = vector.extract_strided_slice %216 {offsets = [0, 96], sizes = [2, 32], strides = [1, 1]} : vector<2x128xf32> to vector<2x32xf32>
    %222 = arith.mulf %219, %208 : vector<2x32xf32>
    %223 = arith.mulf %218, %220 : vector<2x32xf32>
    %224 = arith.addf %222, %223 : vector<2x32xf32>
    %225 = math.tanh %224 : vector<2x32xf32>
    %226 = arith.mulf %221, %225 : vector<2x32xf32>
    %227 = arith.truncf %226 : vector<2x32xf32> to vector<2x32xbf16>
    %cst_44 = arith.constant dense<0.000000e+00> : vector<2x128xf32>
    %228 = tpu.matmul %227, %206, %cst_44 {dimension_numbers = #tpu.dot_dimension_numbers<[1], [0], [0], [1], [0, 0, 1, 1], [], []>} : vector<2x32xbf16>, vector<32x128xbf16>, vector<2x128xf32> -> vector<2x128xf32>
    %229 = arith.addf %228, %73 : vector<2x128xf32>
    %230 = arith.negf %229 : vector<2x128xf32>
    %231 = math.exp %230 : vector<2x128xf32>
    %cst_45 = arith.constant 1.000000e+00 : f32
    %232 = vector.broadcast %cst_45 : f32 to vector<2x128xf32>
    %233 = arith.addf %232, %231 : vector<2x128xf32>
    %234 = arith.divf %232, %233 : vector<2x128xf32>
    %235 = math.tanh %229 : vector<2x128xf32>
    %236 = vector.extract_strided_slice %234 {offsets = [0, 0], sizes = [2, 32], strides = [1, 1]} : vector<2x128xf32> to vector<2x32xf32>
    %237 = vector.extract_strided_slice %234 {offsets = [0, 32], sizes = [2, 32], strides = [1, 1]} : vector<2x128xf32> to vector<2x32xf32>
    %238 = vector.extract_strided_slice %235 {offsets = [0, 64], sizes = [2, 32], strides = [1, 1]} : vector<2x128xf32> to vector<2x32xf32>
    %239 = vector.extract_strided_slice %234 {offsets = [0, 96], sizes = [2, 32], strides = [1, 1]} : vector<2x128xf32> to vector<2x32xf32>
    %240 = arith.mulf %237, %224 : vector<2x32xf32>
    %241 = arith.mulf %236, %238 : vector<2x32xf32>
    %242 = arith.addf %240, %241 : vector<2x32xf32>
    %243 = math.tanh %242 : vector<2x32xf32>
    %244 = arith.mulf %239, %243 : vector<2x32xf32>
    %245 = arith.truncf %244 : vector<2x32xf32> to vector<2x32xbf16>
    %cst_46 = arith.constant dense<0.000000e+00> : vector<2x128xf32>
    %246 = tpu.matmul %245, %206, %cst_46 {dimension_numbers = #tpu.dot_dimension_numbers<[1], [0], [0], [1], [0, 0, 1, 1], [], []>} : vector<2x32xbf16>, vector<32x128xbf16>, vector<2x128xf32> -> vector<2x128xf32>
    %247 = arith.addf %246, %95 : vector<2x128xf32>
    %248 = arith.negf %247 : vector<2x128xf32>
    %249 = math.exp %248 : vector<2x128xf32>
    %cst_47 = arith.constant 1.000000e+00 : f32
    %250 = vector.broadcast %cst_47 : f32 to vector<2x128xf32>
    %251 = arith.addf %250, %249 : vector<2x128xf32>
    %252 = arith.divf %250, %251 : vector<2x128xf32>
    %253 = math.tanh %247 : vector<2x128xf32>
    %254 = vector.extract_strided_slice %252 {offsets = [0, 0], sizes = [2, 32], strides = [1, 1]} : vector<2x128xf32> to vector<2x32xf32>
    %255 = vector.extract_strided_slice %252 {offsets = [0, 32], sizes = [2, 32], strides = [1, 1]} : vector<2x128xf32> to vector<2x32xf32>
    %256 = vector.extract_strided_slice %253 {offsets = [0, 64], sizes = [2, 32], strides = [1, 1]} : vector<2x128xf32> to vector<2x32xf32>
    %257 = vector.extract_strided_slice %252 {offsets = [0, 96], sizes = [2, 32], strides = [1, 1]} : vector<2x128xf32> to vector<2x32xf32>
    %258 = arith.mulf %255, %242 : vector<2x32xf32>
    %259 = arith.mulf %254, %256 : vector<2x32xf32>
    %260 = arith.addf %258, %259 : vector<2x32xf32>
    %261 = math.tanh %260 : vector<2x32xf32>
    %262 = arith.mulf %257, %261 : vector<2x32xf32>
    %263 = arith.truncf %262 : vector<2x32xf32> to vector<2x32xbf16>
    %cst_48 = arith.constant dense<0.000000e+00> : vector<2x128xf32>
    %264 = tpu.matmul %263, %206, %cst_48 {dimension_numbers = #tpu.dot_dimension_numbers<[1], [0], [0], [1], [0, 0, 1, 1], [], []>} : vector<2x32xbf16>, vector<32x128xbf16>, vector<2x128xf32> -> vector<2x128xf32>
    %265 = arith.addf %264, %117 : vector<2x128xf32>
    %266 = arith.negf %265 : vector<2x128xf32>
    %267 = math.exp %266 : vector<2x128xf32>
    %cst_49 = arith.constant 1.000000e+00 : f32
    %268 = vector.broadcast %cst_49 : f32 to vector<2x128xf32>
    %269 = arith.addf %268, %267 : vector<2x128xf32>
    %270 = arith.divf %268, %269 : vector<2x128xf32>
    %271 = math.tanh %265 : vector<2x128xf32>
    %272 = vector.extract_strided_slice %270 {offsets = [0, 0], sizes = [2, 32], strides = [1, 1]} : vector<2x128xf32> to vector<2x32xf32>
    %273 = vector.extract_strided_slice %270 {offsets = [0, 32], sizes = [2, 32], strides = [1, 1]} : vector<2x128xf32> to vector<2x32xf32>
    %274 = vector.extract_strided_slice %271 {offsets = [0, 64], sizes = [2, 32], strides = [1, 1]} : vector<2x128xf32> to vector<2x32xf32>
    %275 = vector.extract_strided_slice %270 {offsets = [0, 96], sizes = [2, 32], strides = [1, 1]} : vector<2x128xf32> to vector<2x32xf32>
    %276 = arith.mulf %273, %260 : vector<2x32xf32>
    %277 = arith.mulf %272, %274 : vector<2x32xf32>
    %278 = arith.addf %276, %277 : vector<2x32xf32>
    %279 = math.tanh %278 : vector<2x32xf32>
    %280 = arith.mulf %275, %279 : vector<2x32xf32>
    %281 = arith.truncf %280 : vector<2x32xf32> to vector<2x32xbf16>
    %cst_50 = arith.constant dense<0.000000e+00> : vector<2x128xf32>
    %282 = tpu.matmul %281, %206, %cst_50 {dimension_numbers = #tpu.dot_dimension_numbers<[1], [0], [0], [1], [0, 0, 1, 1], [], []>} : vector<2x32xbf16>, vector<32x128xbf16>, vector<2x128xf32> -> vector<2x128xf32>
    %283 = arith.addf %282, %139 : vector<2x128xf32>
    %284 = arith.negf %283 : vector<2x128xf32>
    %285 = math.exp %284 : vector<2x128xf32>
    %cst_51 = arith.constant 1.000000e+00 : f32
    %286 = vector.broadcast %cst_51 : f32 to vector<2x128xf32>
    %287 = arith.addf %286, %285 : vector<2x128xf32>
    %288 = arith.divf %286, %287 : vector<2x128xf32>
    %289 = math.tanh %283 : vector<2x128xf32>
    %290 = vector.extract_strided_slice %288 {offsets = [0, 0], sizes = [2, 32], strides = [1, 1]} : vector<2x128xf32> to vector<2x32xf32>
    %291 = vector.extract_strided_slice %288 {offsets = [0, 32], sizes = [2, 32], strides = [1, 1]} : vector<2x128xf32> to vector<2x32xf32>
    %292 = vector.extract_strided_slice %289 {offsets = [0, 64], sizes = [2, 32], strides = [1, 1]} : vector<2x128xf32> to vector<2x32xf32>
    %293 = vector.extract_strided_slice %288 {offsets = [0, 96], sizes = [2, 32], strides = [1, 1]} : vector<2x128xf32> to vector<2x32xf32>
    %294 = arith.mulf %291, %278 : vector<2x32xf32>
    %295 = arith.mulf %290, %292 : vector<2x32xf32>
    %296 = arith.addf %294, %295 : vector<2x32xf32>
    %297 = math.tanh %296 : vector<2x32xf32>
    %298 = arith.mulf %293, %297 : vector<2x32xf32>
    %299 = arith.truncf %298 : vector<2x32xf32> to vector<2x32xbf16>
    %cst_52 = arith.constant dense<0.000000e+00> : vector<2x128xf32>
    %300 = tpu.matmul %299, %206, %cst_52 {dimension_numbers = #tpu.dot_dimension_numbers<[1], [0], [0], [1], [0, 0, 1, 1], [], []>} : vector<2x32xbf16>, vector<32x128xbf16>, vector<2x128xf32> -> vector<2x128xf32>
    %301 = arith.addf %300, %161 : vector<2x128xf32>
    %302 = arith.negf %301 : vector<2x128xf32>
    %303 = math.exp %302 : vector<2x128xf32>
    %cst_53 = arith.constant 1.000000e+00 : f32
    %304 = vector.broadcast %cst_53 : f32 to vector<2x128xf32>
    %305 = arith.addf %304, %303 : vector<2x128xf32>
    %306 = arith.divf %304, %305 : vector<2x128xf32>
    %307 = math.tanh %301 : vector<2x128xf32>
    %308 = vector.extract_strided_slice %306 {offsets = [0, 0], sizes = [2, 32], strides = [1, 1]} : vector<2x128xf32> to vector<2x32xf32>
    %309 = vector.extract_strided_slice %306 {offsets = [0, 32], sizes = [2, 32], strides = [1, 1]} : vector<2x128xf32> to vector<2x32xf32>
    %310 = vector.extract_strided_slice %307 {offsets = [0, 64], sizes = [2, 32], strides = [1, 1]} : vector<2x128xf32> to vector<2x32xf32>
    %311 = vector.extract_strided_slice %306 {offsets = [0, 96], sizes = [2, 32], strides = [1, 1]} : vector<2x128xf32> to vector<2x32xf32>
    %312 = arith.mulf %309, %296 : vector<2x32xf32>
    %313 = arith.mulf %308, %310 : vector<2x32xf32>
    %314 = arith.addf %312, %313 : vector<2x32xf32>
    %315 = math.tanh %314 : vector<2x32xf32>
    %316 = arith.mulf %311, %315 : vector<2x32xf32>
    %317 = arith.truncf %316 : vector<2x32xf32> to vector<2x32xbf16>
    %cst_54 = arith.constant dense<0.000000e+00> : vector<2x128xf32>
    %318 = tpu.matmul %317, %206, %cst_54 {dimension_numbers = #tpu.dot_dimension_numbers<[1], [0], [0], [1], [0, 0, 1, 1], [], []>} : vector<2x32xbf16>, vector<32x128xbf16>, vector<2x128xf32> -> vector<2x128xf32>
    %319 = arith.addf %318, %183 : vector<2x128xf32>
    %320 = arith.negf %319 : vector<2x128xf32>
    %321 = math.exp %320 : vector<2x128xf32>
    %cst_55 = arith.constant 1.000000e+00 : f32
    %322 = vector.broadcast %cst_55 : f32 to vector<2x128xf32>
    %323 = arith.addf %322, %321 : vector<2x128xf32>
    %324 = arith.divf %322, %323 : vector<2x128xf32>
    %325 = math.tanh %319 : vector<2x128xf32>
    %326 = vector.extract_strided_slice %324 {offsets = [0, 0], sizes = [2, 32], strides = [1, 1]} : vector<2x128xf32> to vector<2x32xf32>
    %327 = vector.extract_strided_slice %324 {offsets = [0, 32], sizes = [2, 32], strides = [1, 1]} : vector<2x128xf32> to vector<2x32xf32>
    %328 = vector.extract_strided_slice %325 {offsets = [0, 64], sizes = [2, 32], strides = [1, 1]} : vector<2x128xf32> to vector<2x32xf32>
    %329 = vector.extract_strided_slice %324 {offsets = [0, 96], sizes = [2, 32], strides = [1, 1]} : vector<2x128xf32> to vector<2x32xf32>
    %330 = arith.mulf %327, %314 : vector<2x32xf32>
    %331 = arith.mulf %326, %328 : vector<2x32xf32>
    %332 = arith.addf %330, %331 : vector<2x32xf32>
    %333 = math.tanh %332 : vector<2x32xf32>
    %334 = arith.mulf %329, %333 : vector<2x32xf32>
    %335 = arith.truncf %334 : vector<2x32xf32> to vector<2x32xbf16>
    %cst_56 = arith.constant dense<0.000000e+00> : vector<2x128xf32>
    %336 = tpu.matmul %335, %206, %cst_56 {dimension_numbers = #tpu.dot_dimension_numbers<[1], [0], [0], [1], [0, 0, 1, 1], [], []>} : vector<2x32xbf16>, vector<32x128xbf16>, vector<2x128xf32> -> vector<2x128xf32>
    %337 = arith.addf %336, %205 : vector<2x128xf32>
    %338 = arith.negf %337 : vector<2x128xf32>
    %339 = math.exp %338 : vector<2x128xf32>
    %cst_57 = arith.constant 1.000000e+00 : f32
    %340 = vector.broadcast %cst_57 : f32 to vector<2x128xf32>
    %341 = arith.addf %340, %339 : vector<2x128xf32>
    %342 = arith.divf %340, %341 : vector<2x128xf32>
    %343 = math.tanh %337 : vector<2x128xf32>
    %344 = vector.extract_strided_slice %342 {offsets = [0, 0], sizes = [2, 32], strides = [1, 1]} : vector<2x128xf32> to vector<2x32xf32>
    %345 = vector.extract_strided_slice %342 {offsets = [0, 32], sizes = [2, 32], strides = [1, 1]} : vector<2x128xf32> to vector<2x32xf32>
    %346 = vector.extract_strided_slice %343 {offsets = [0, 64], sizes = [2, 32], strides = [1, 1]} : vector<2x128xf32> to vector<2x32xf32>
    %347 = vector.extract_strided_slice %342 {offsets = [0, 96], sizes = [2, 32], strides = [1, 1]} : vector<2x128xf32> to vector<2x32xf32>
    %348 = arith.mulf %345, %332 : vector<2x32xf32>
    %349 = arith.mulf %344, %346 : vector<2x32xf32>
    %350 = arith.addf %348, %349 : vector<2x32xf32>
    %351 = math.tanh %350 : vector<2x32xf32>
    %352 = arith.mulf %347, %351 : vector<2x32xf32>
    %c0_58 = arith.constant 0 : index
    %c0_59 = arith.constant 0 : index
    %353 = vector.load %arg7[%c0_58, %c0_59] : memref<1x32xf32, #tpu.memory_space<vmem>>, vector<1x32xf32>
    %354 = vector.broadcast %353 : vector<1x32xf32> to vector<2x32xf32>
    %355 = arith.mulf %352, %354 : vector<2x32xf32>
    %cst_60 = arith.constant dense<0.000000e+00> : vector<2xf32>
    %356 = vector.multi_reduction <add>, %355, %cst_60 [1] : vector<2x32xf32> to vector<2xf32>
    %357 = vector.shape_cast %356 : vector<2xf32> to vector<2x1xf32>
    %c0_61 = arith.constant 0 : index
    %c0_62 = arith.constant 0 : index
    %358 = memref.load %arg8[%c0_61, %c0_62] : memref<1x1xf32, #tpu.memory_space<smem>>
    %359 = vector.broadcast %358 : f32 to vector<2x1xf32>
    %360 = arith.addf %357, %359 : vector<2x1xf32>
    %c0_63 = arith.constant 0 : index
    %c0_64 = arith.constant 0 : index
    %361 = vector.load %arg9[%c0_63, %c0_64] : memref<2x1xf32, #tpu.memory_space<vmem>>, vector<2x1xf32>
    tpu.vector_store %arg9[%c0_63, %c0_64], %360 {strides = array<i32>} : memref<2x1xf32, #tpu.memory_space<vmem>>, vector<2x1xf32>,
    return
  }
}

</mosaic_0001>

<bundles_post_ra>
// kernel: tpu_custom_call.1
= control target key start
LH: loop header
LB: loop body
LE: loop exit
PB: predicated region body
PF: predicated region fallthrough
CT: control target
= control target key end

     0   :  { %15 = vsyncpa [#allocation4], 0  ;;  %s2611_s0 = inlined_call_operand.vmem [shape: f32[2,8,4], index: 0, kind: input, shape index: {}]   ;;  %s2612_s1 = inlined_call_operand.hbm [shape: bf16[4,128], index: 1, kind: input, shape index: {}]   ;;  %s2613_s2 = inlined_call_operand.vmem [shape: bf16[32,128], index: 2, kind: input, shape index: {}]   ;;  %s2614_s3 = inlined_call_operand.vmem [shape: f32[1,128], index: 3, kind: input, shape index: {}]   ;;  %s2615_s4 = inlined_call_operand.vmem [shape: bf16[32,128], index: 4, kind: input, shape index: {}]   ;;  %s2616_s5 = inlined_call_operand.hbm [shape: bf16[32,128], index: 5, kind: input, shape index: {}]   ;;  %s2617_s6 = inlined_call_operand.vmem [shape: f32[1,128], index: 6, kind: input, shape index: {}]   ;;  %s2618_s7 = inlined_call_operand.vmem [shape: f32[1,32], index: 7, kind: input, shape index: {}]   ;;  %s2619_s8 = inlined_call_operand.<no memory space> [shape: f32[1,1], index: 8, kind: input, shape index: {}]   ;;  %s2620_s9 = inlined_call_operand.vmem [shape: f32[2,1], index: 9, kind: output, shape index: {}]  }
   0x1   :  { %16 = vsyncpa [#allocation6], 0  ;;  %s2197_s30 = smov [#allocation3]   ;;  %s2198_s11 = smov [#allocation5]  }
   0x2   :  { %s25_s10 = sshll.u32 %s2197_s30, 4  ;;  %s40_s12 = sshll.u32 %s2198_s11, 4  ;;  %s26_s10 = int_to_ptr.vmem [resolvable:$true] %s25_s10  ;;  %s41_s12 = int_to_ptr.vmem [resolvable:$true] %s40_s12 }
   0x3   :  { %s2161_s13 = scalar_lea.vmem %s26_s10, 32  ;;  %p2166_p1 = scmp.lt.s32.totalorder %s26_s10, %s26_s10 }
   0x4   :  { %p2162_p0 = scmp.ne.s32.totalorder %s26_s10, %s2161_s13  ;;  %p2167_p2 = scmp.lt.s32.totalorder %s2161_s13, %s2161_s13 }
   0x6   :  { %p2168_p3 = por %p2167_p2, %p2166_p1 }
   0x8   :  { %p2169_p4 = pnand %p2168_p3, %p2162_p0 }
   0xa   :  { %2172 = shalt.err (!%p2169_p4)
}
   0xb   :  { %28 = dma.hbm_to_vmem [thread:$0]  %s2612_s1, 32, %s26_s10, [#allocation4]  }
   0xc   :  { %s2181_s16 = scalar_lea.vmem %s41_s12, 256  ;;  %p2186_p6 = scmp.lt.s32.totalorder %s41_s12, %s41_s12 }
   0xd   :  { %p2182_p5 = scmp.ne.s32.totalorder %s41_s12, %s2181_s16  ;;  %p2187_p7 = scmp.lt.s32.totalorder %s2181_s16, %s2181_s16 }
   0xf   :  { %p2188_p8 = por %p2187_p7, %p2186_p6 }
  0x11   :  { %p2189_p9 = pnand %p2188_p8, %p2182_p5 }
  0x13   :  { %2192 = shalt.err (!%p2189_p9)
}
  0x14   :  { %s2199_s17 = smov 64   ;;  %s2200_s18 = smov 4  }
  0x15   :  { %46 = dma.hbm_to_vmem [thread:$0]  %s2616_s5, 256, %s41_s12, [#allocation6], %s2199_s17, %s2199_s17, %s2200_s18  }
  0x16   :  { %2193 = dma.done.wait [#allocation4], 32  }
  0x17   :  { %2194 = vsyncadd [#allocation4], 4294967264 }
  0x18   :  { %2195 = dma.done.wait [#allocation6], 256  }
  0x19   :  { %2196 = vsyncadd [#allocation6], 4294967040  ;;  %v2201_v0 = vmov 0.0   ;;  %vm2202_vm0 = vmmov 0   ;;  %vm75_vm1 = vcmask 1041408   ;;  %v2273_v3 = vld [vmem:[%s2613_s2 + $0x8] sm:$0xff]  }
  0x1a   :  { %1812 = vmatprep.subr.bf16.mxu0 %v2201_v0  ;;  %1818 = vmatprep.subr.bf16.mxu1 %v2201_v0  ;;  %v60_v1 = vld [vmem:[#allocation3] sm:$0x3]  ;;  %v63_v5 = vld [vmem:[%s2611_s0 + $0x8] sm:$0xff]  ;;  %vm71_vm2 = vcmask 31744   ;;  %v2203_v8 = vmov 0   ;;  %vm144_vm3 = vcmask 1041409  }
  0x1b   :  { %1814 = vmatprep.mubr.msk.bf16.mxu0 %vm2202_vm0, %v2201_v0  ;;  %1822 = vmatprep.mubr.msk.bf16.mxu1 %vm2202_vm0, %v2201_v0  ;;  %v77_v2 = vsel %vm75_vm1, %v60_v1, 0  ;;  %v62_v4 = vld [vmem:[%s2611_s0] sm:$0xff]  ;;  %v2330_v53 = vld [vmem:[%s2615_s4 + $0x8] sm:$0xff]   ;;  %vm147_vm4 = vcmask 261120   ;;  %s2205_s12 = smov 96   ;;  %vm1675_vm5 = vcmask 254976  }
  0x1c   :  { %1813 = vmatpush3.bf16.msra.mxu0 %v77_v2  ;;  %v64_v6 = vpack.c.bf16 %v63_v5, %v62_v4  ;;  %1819 = vmatpush3.bf16.msra.mxu1 %v2273_v3  ;;  %v2285_v7 = vld [vmem:[%s2613_s2] sm:$0xff]   ;;  %vm1682_vm6 = vcmask 1024  }
  0x1d   :  { %1826 = vmatprep.subr.bf16.mxu0 %v2201_v0  ;;  %1820 = vmatprep.subr.bf16.mxu1 %v2201_v0  ;;  %v1690_v9 = vld [vmem:[%s2614_s3] ss:$0 sm:$0xff]  ;;  %s2204_s3 = smov 32  }
  0x1e   :  { %v2336_v54 = vld [vmem:[%s2615_s4] sm:$0xff]  }
  0x1f   :  { %1815 = vmatmul.mubr.msk.bf16.vlgmr.msra.gmra.mxu0 %vm71_vm2, %v64_v6 }
  0x20   :  { %1830 = vmatprep.mubr.msk.bf16.mxu0 %vm2202_vm0, %v2201_v0  ;;  %1821 = vmatpush3.bf16.msra.mxu1 %v2285_v7 }
  0x21   :  { %1834 = vmatprep.subr.bf16.mxu1 %v2201_v0  ;;  %1827 = vmatpush3.bf16.msra.mxu0 %v2330_v53 }
  0x22   :  { %1828 = vmatprep.subr.bf16.mxu0 %v2201_v0 }
  0x23   :  { %1823 = vmatmul.mubr.bf16.vlgmr.msra.gmra.mxu1 %v2203_v8 }
  0x24   :  { %1835 = vmatpush3.bf16.msra.mxu1 %v2273_v3  ;;  %1838 = vmatprep.mubr.msk.bf16.mxu1 %vm2202_vm0, %v2201_v0 }
  0x25   :  { %1836 = vmatprep.subr.bf16.mxu1 %v2201_v0  ;;  %1829 = vmatpush3.bf16.msra.mxu0 %v2336_v54 }
  0x26   :  { %1842 = vmatprep.subr.bf16.mxu0 %v2201_v0 }
  0x28   :  { %1837 = vmatpush3.bf16.msra.mxu1 %v2285_v7 }
  0x29   :  { %1850 = vmatprep.subr.bf16.mxu1 %v2201_v0 }
  0xdf   :  { %v113_v10 = vpop.f32.mrf.mxu0 }
  0xe0   :  { %v114_v11 = vadd.f32 %v1690_v9, %v113_v10 }
  0xe1   :  { %v1816_v12 = vpop.f32.mrf.mxu0 }
  0xe2   :  { %v280_v16 = vrot.slane %v114_v11, 1  ;;  %v394_v17 = vrot.slane %v114_v11, 2  ;;  %v509_v19 = vrot.slane %v114_v11, 3  ;;  %v624_v20 = vrot.slane %v114_v11, 4 }
  0xe3   :  { %v116_v13 = vpop.f32.mrf.mxu0  ;;  %v185_v15 = vpop.f32.mrf.mxu1  ;;  %v739_v21 = vrot.slane %v114_v11, 5  ;;  %v854_v22 = vrot.slane %v114_v11, 6  ;;  %v969_v36 = vrot.slane %v114_v11, 7 }
  0xe4   :  { %v117_v14 = vadd.f32 %v1690_v9, %v116_v13 }
  0xe5   :  { %v1817_v18 = vpop.f32.mrf.mxu0  ;;  %v1824_v24 = vpop.f32.mrf.mxu1 }
  0xe6   :  { %v143_v23 = vrot.slane %v117_v14, 7  ;;  %v2304_v25 = vsel %vm144_vm3, %v117_v14, %v280_v16  ;;  %v395_v26 = vrot.slane %v117_v14, 1  ;;  %v510_v27 = vrot.slane %v117_v14, 2 }
  0xe7   :  { %v625_v28 = vrot.slane %v117_v14, 3  ;;  %v740_v29 = vrot.slane %v117_v14, 4  ;;  %v855_v30 = vrot.slane %v117_v14, 5  ;;  %v970_v31 = vrot.slane %v117_v14, 6  ;;  %v188_v33 = vpop.f32.mrf.mxu1 }
  0xe8   :  { %v145_v32 = vsel %vm144_vm3, %v143_v23, %v114_v11  ;;  %v2308_v34 = vsel %vm144_vm3, %v395_v26, %v394_v17  ;;  %v2311_v35 = vsel %vm144_vm3, %v510_v27, %v509_v19 }
  0xe9   :  { %v186_v37 = vadd.f32 %v185_v15, %v145_v32  ;;  %v2314_v38 = vsel %vm144_vm3, %v625_v28, %v624_v20  ;;  %v2317_v39 = vsel %vm144_vm3, %v740_v29, %v739_v21  ;;  %v2320_v40 = vsel %vm144_vm3, %v855_v30, %v854_v22  ;;  %v1825_v41 = vpop.f32.mrf.mxu1 }
  0xea   :  { %v2323_v42 = vsel %vm144_vm3, %v970_v31, %v969_v36 }
  0xeb   :  { %2025 = vtanh.f32 %v186_v37  ;;  %v1694_v44 = vmul.f32 -1.442695, %v186_v37 }
  0xed   :  { %2027 = vpow2.f32 %v1694_v44 }
  0xf8   :  { %v2026_v43 = vpop.eup %2025 }
  0xf9   :  { %200 = vrot.lane.b32.xlu0 %v2026_v43, %s2199_s17 }
  0xfa   :  { %v2028_v45 = vpop.eup %2027 }
  0xfb   :  { %v194_v46 = vadd.f32 1.0, %v2028_v45 }
  0xfd   :  { %2029 = vrcp.f32 %v194_v46 }
 0x10a   :  { %v2030_v47 = vpop.eup %2029 }
 0x10b   :  { %v198_v50 = vmul.f32 0.0, %v2030_v47 }
 0x16b   :  { %v201_v48 = vpop.permute.xlu0 %200 }
 0x16c   :  { %v203_v49 = vmul.f32 %v2030_v47, %v201_v48 }
 0x16e   :  { %205 = vrot.lane.b32.xlu0 %v203_v49, %s2204_s3 }
 0x1e0   :  { %v206_v51 = vpop.permute.xlu0 %205 }
 0x1e1   :  { %v208_v52 = vadd.f32 %v206_v51, %v198_v50 }
 0x1e3   :  { %2031 = vtanh.f32 %v208_v52 }
 0x1f0   :  { %v2032_v55 = vpop.eup %2031 }
 0x1f1   :  { %211 = vrot.lane.b32.xlu1 %v2032_v55, %s2199_s17 }
 0x263   :  { %v212_v56 = vpop.permute.xlu1 %211 }
 0x264   :  { %v214_v57 = vmul.f32 %v2030_v47, %v212_v56 }
 0x266   :  { %v215_v58 = vpack.c.bf16 %v214_v57, %v214_v57 }
 0x268   :  { %223 = vrot.lane.b32.xlu1 %v215_v58, %s2204_s3 }
 0x2da   :  { %v224_v59 = vpop.permute.xlu1 %223 }
 0x2db   :  { %1831 = vmatmul.mubr.msk.bf16.vlgmr.msra.gmra.mxu0 %vm147_vm4, %v224_v59  ;;  %1839 = vmatmul.mubr.msk.bf16.vlgmr.msra.gmra.mxu1 %vm147_vm4, %v224_v59 }
 0x2dc   :  { %1851 = vmatpush3.bf16.msra.mxu1 %v2273_v3  ;;  %1843 = vmatpush3.bf16.msra.mxu0 %v2330_v53 }
 0x2dd   :  { %1852 = vmatprep.subr.bf16.mxu1 %v2201_v0  ;;  %1844 = vmatprep.subr.bf16.mxu0 %v2201_v0 }
 0x2de   :  { %1854 = vmatprep.mubr.msk.bf16.mxu1 %vm2202_vm0, %v2201_v0  ;;  %1846 = vmatprep.mubr.msk.bf16.mxu0 %vm2202_vm0, %v2201_v0 }
 0x2e0   :  { %1853 = vmatpush3.bf16.msra.mxu1 %v2285_v7  ;;  %1845 = vmatpush3.bf16.msra.mxu0 %v2336_v54 }
 0x2e1   :  { %1866 = vmatprep.subr.bf16.mxu1 %v2201_v0  ;;  %1858 = vmatprep.subr.bf16.mxu0 %v2201_v0 }
 0x39b   :  { %v2357_v60 = vpop.f32.mrf.mxu0  ;;  %v317_v61 = vpop.f32.mrf.mxu1 }
 0x39c   :  { %v318_v62 = vadd.f32 %v317_v61, %v2304_v25 }
 0x39d   :  { %v1832_v63 = vpop.f32.mrf.mxu0  ;;  %v1840_v1 = vpop.f32.mrf.mxu1 }
 0x39e   :  { %2033 = vtanh.f32 %v318_v62  ;;  %v1700_v10 = vmul.f32 -1.442695, %v318_v62 }
 0x39f   :  { %v277_v2 = vpop.f32.mrf.mxu0  ;;  %v320_v4 = vpop.f32.mrf.mxu1 }
 0x3a0   :  { %2035 = vpow2.f32 %v1700_v10 }
 0x3a1   :  { %v1833_v5 = vpop.f32.mrf.mxu0  ;;  %v1841_v6 = vpop.f32.mrf.mxu1 }
 0x3ab   :  { %v2034_v9 = vpop.eup %2033 }
 0x3ac   :  { %332 = vrot.lane.b32.xlu0 %v2034_v9, %s2199_s17 }
 0x3ad   :  { %v2036_v11 = vpop.eup %2035 }
 0x3ae   :  { %v326_v12 = vadd.f32 1.0, %v2036_v11 }
 0x3b0   :  { %2037 = vrcp.f32 %v326_v12 }
 0x3bd   :  { %v2038_v13 = vpop.eup %2037 }
 0x3be   :  { %v330_v16 = vmul.f32 %v2038_v13, %v208_v52 }
 0x41e   :  { %v333_v14 = vpop.permute.xlu0 %332 }
 0x41f   :  { %v335_v15 = vmul.f32 %v2038_v13, %v333_v14 }
 0x421   :  { %337 = vrot.lane.b32.xlu1 %v335_v15, %s2204_s3 }
 0x493   :  { %v338_v17 = vpop.permute.xlu1 %337 }
 0x494   :  { %v340_v18 = vadd.f32 %v338_v17, %v330_v16 }
 0x496   :  { %2039 = vtanh.f32 %v340_v18 }
 0x4a3   :  { %v2040_v19 = vpop.eup %2039 }
 0x4a4   :  { %343 = vrot.lane.b32.xlu0 %v2040_v19, %s2199_s17 }
 0x516   :  { %v344_v20 = vpop.permute.xlu0 %343 }
 0x517   :  { %v346_v21 = vmul.f32 %v2038_v13, %v344_v20 }
 0x519   :  { %v347_v22 = vpack.c.bf16 %v346_v21, %v346_v21 }
 0x51b   :  { %349 = vrot.lane.b32.xlu1 %v347_v22, %s2204_s3 }
 0x58d   :  { %v350_v23 = vpop.permute.xlu1 %349 }
 0x58e   :  { %1847 = vmatmul.mubr.msk.bf16.vlgmr.msra.gmra.mxu0 %vm147_vm4, %v350_v23  ;;  %1855 = vmatmul.mubr.msk.bf16.vlgmr.msra.gmra.mxu1 %vm147_vm4, %v350_v23 }
 0x58f   :  { %1867 = vmatpush3.bf16.msra.mxu1 %v2273_v3  ;;  %1859 = vmatpush3.bf16.msra.mxu0 %v2330_v53 }
 0x590   :  { %1868 = vmatprep.subr.bf16.mxu1 %v2201_v0  ;;  %1860 = vmatprep.subr.bf16.mxu0 %v2201_v0 }
 0x591   :  { %1870 = vmatprep.mubr.msk.bf16.mxu1 %vm2202_vm0, %v2201_v0  ;;  %1862 = vmatprep.mubr.msk.bf16.mxu0 %vm2202_vm0, %v2201_v0 }
 0x593   :  { %1869 = vmatpush3.bf16.msra.mxu1 %v2285_v7  ;;  %1861 = vmatpush3.bf16.msra.mxu0 %v2336_v54 }
 0x594   :  { %1882 = vmatprep.subr.bf16.mxu1 %v2201_v0  ;;  %1874 = vmatprep.subr.bf16.mxu0 %v2201_v0 }
 0x64e   :  { %v2378_v24 = vpop.f32.mrf.mxu0  ;;  %v432_v25 = vpop.f32.mrf.mxu1 }
 0x64f   :  { %v433_v26 = vadd.f32 %v432_v25, %v2308_v34 }
 0x650   :  { %v1848_v27 = vpop.f32.mrf.mxu0  ;;  %v1856_v28 = vpop.f32.mrf.mxu1 }
 0x651   :  { %2041 = vtanh.f32 %v433_v26  ;;  %v1703_v36 = vmul.f32 -1.442695, %v433_v26 }
 0x652   :  { %v391_v29 = vpop.f32.mrf.mxu0  ;;  %v435_v30 = vpop.f32.mrf.mxu1 }
 0x653   :  { %2043 = vpow2.f32 %v1703_v36 }
 0x654   :  { %v1849_v31 = vpop.f32.mrf.mxu0  ;;  %v1857_v32 = vpop.f32.mrf.mxu1 }
 0x65e   :  { %v2042_v33 = vpop.eup %2041 }
 0x65f   :  { %447 = vrot.lane.b32.xlu0 %v2042_v33, %s2199_s17 }
 0x660   :  { %v2044_v37 = vpop.eup %2043 }
 0x661   :  { %v441_v41 = vadd.f32 1.0, %v2044_v37 }
 0x663   :  { %2045 = vrcp.f32 %v441_v41 }
 0x670   :  { %v2046_v43 = vpop.eup %2045 }
 0x671   :  { %v445_v34 = vmul.f32 %v2046_v43, %v340_v18 }
 0x6d1   :  { %v448_v44 = vpop.permute.xlu0 %447 }
 0x6d2   :  { %v450_v45 = vmul.f32 %v2046_v43, %v448_v44 }
 0x6d4   :  { %452 = vrot.lane.b32.xlu1 %v450_v45, %s2204_s3 }
 0x746   :  { %v453_v46 = vpop.permute.xlu1 %452 }
 0x747   :  { %v455_v47 = vadd.f32 %v453_v46, %v445_v34 }
 0x749   :  { %2047 = vtanh.f32 %v455_v47 }
 0x756   :  { %v2048_v48 = vpop.eup %2047 }
 0x757   :  { %458 = vrot.lane.b32.xlu0 %v2048_v48, %s2199_s17 }
 0x7c9   :  { %v459_v49 = vpop.permute.xlu0 %458 }
 0x7ca   :  { %v461_v50 = vmul.f32 %v2046_v43, %v459_v49 }
 0x7cc   :  { %v462_v51 = vpack.c.bf16 %v461_v50, %v461_v50 }
 0x7ce   :  { %464 = vrot.lane.b32.xlu1 %v462_v51, %s2204_s3 }
 0x840   :  { %v465_v52 = vpop.permute.xlu1 %464 }
 0x841   :  { %1863 = vmatmul.mubr.msk.bf16.vlgmr.msra.gmra.mxu0 %vm147_vm4, %v465_v52  ;;  %1871 = vmatmul.mubr.msk.bf16.vlgmr.msra.gmra.mxu1 %vm147_vm4, %v465_v52 }
 0x842   :  { %1883 = vmatpush3.bf16.msra.mxu1 %v2273_v3  ;;  %1875 = vmatpush3.bf16.msra.mxu0 %v2330_v53 }
 0x843   :  { %1884 = vmatprep.subr.bf16.mxu1 %v2201_v0  ;;  %1876 = vmatprep.subr.bf16.mxu0 %v2201_v0 }
 0x844   :  { %1886 = vmatprep.mubr.msk.bf16.mxu1 %vm2202_vm0, %v2201_v0  ;;  %1878 = vmatprep.mubr.msk.bf16.mxu0 %vm2202_vm0, %v2201_v0 }
 0x846   :  { %1885 = vmatpush3.bf16.msra.mxu1 %v2285_v7  ;;  %1877 = vmatpush3.bf16.msra.mxu0 %v2336_v54 }
 0x847   :  { %1898 = vmatprep.subr.bf16.mxu1 %v2201_v0  ;;  %1890 = vmatprep.subr.bf16.mxu0 %v2201_v0 }
 0x901   :  { %v2399_v55 = vpop.f32.mrf.mxu0  ;;  %v547_v56 = vpop.f32.mrf.mxu1 }
 0x902   :  { %v548_v57 = vadd.f32 %v547_v56, %v2311_v35 }
 0x903   :  { %v1864_v58 = vpop.f32.mrf.mxu0  ;;  %v1872_v59 = vpop.f32.mrf.mxu1 }
 0x904   :  { %2049 = vtanh.f32 %v548_v57  ;;  %v1706_v4 = vmul.f32 -1.442695, %v548_v57 }
 0x905   :  { %v506_v61 = vpop.f32.mrf.mxu0  ;;  %v550_v62 = vpop.f32.mrf.mxu1 }
 0x906   :  { %2051 = vpow2.f32 %v1706_v4 }
 0x907   :  { %v1865_v63 = vpop.f32.mrf.mxu0  ;;  %v1873_v1 = vpop.f32.mrf.mxu1 }
 0x911   :  { %v2050_v2 = vpop.eup %2049 }
 0x912   :  { %562 = vrot.lane.b32.xlu0 %v2050_v2, %s2199_s17 }
 0x913   :  { %v2052_v5 = vpop.eup %2051 }
 0x914   :  { %v556_v6 = vadd.f32 1.0, %v2052_v5 }
 0x916   :  { %2053 = vrcp.f32 %v556_v6 }
 0x923   :  { %v2054_v9 = vpop.eup %2053 }
 0x924   :  { %v560_v35 = vmul.f32 %v2054_v9, %v455_v47 }
 0x984   :  { %v563_v10 = vpop.permute.xlu0 %562 }
 0x985   :  { %v565_v11 = vmul.f32 %v2054_v9, %v563_v10 }
 0x987   :  { %567 = vrot.lane.b32.xlu1 %v565_v11, %s2204_s3 }
 0x9f9   :  { %v568_v12 = vpop.permute.xlu1 %567 }
 0x9fa   :  { %v570_v13 = vadd.f32 %v568_v12, %v560_v35 }
 0x9fc   :  { %2055 = vtanh.f32 %v570_v13 }
 0xa09   :  { %v2056_v14 = vpop.eup %2055 }
 0xa0a   :  { %573 = vrot.lane.b32.xlu0 %v2056_v14, %s2199_s17 }
 0xa7c   :  { %v574_v15 = vpop.permute.xlu0 %573 }
 0xa7d   :  { %v576_v16 = vmul.f32 %v2054_v9, %v574_v15 }
 0xa7f   :  { %v577_v17 = vpack.c.bf16 %v576_v16, %v576_v16 }
 0xa81   :  { %579 = vrot.lane.b32.xlu1 %v577_v17, %s2204_s3 }
 0xaf3   :  { %v580_v18 = vpop.permute.xlu1 %579 }
 0xaf4   :  { %1879 = vmatmul.mubr.msk.bf16.vlgmr.msra.gmra.mxu0 %vm147_vm4, %v580_v18  ;;  %1887 = vmatmul.mubr.msk.bf16.vlgmr.msra.gmra.mxu1 %vm147_vm4, %v580_v18 }
 0xaf5   :  { %1899 = vmatpush3.bf16.msra.mxu1 %v2273_v3  ;;  %1891 = vmatpush3.bf16.msra.mxu0 %v2330_v53 }
 0xaf6   :  { %1900 = vmatprep.subr.bf16.mxu1 %v2201_v0  ;;  %1892 = vmatprep.subr.bf16.mxu0 %v2201_v0 }
 0xaf7   :  { %1902 = vmatprep.mubr.msk.bf16.mxu1 %vm2202_vm0, %v2201_v0  ;;  %1894 = vmatprep.mubr.msk.bf16.mxu0 %vm2202_vm0, %v2201_v0 }
 0xaf9   :  { %1901 = vmatpush3.bf16.msra.mxu1 %v2285_v7  ;;  %1893 = vmatpush3.bf16.msra.mxu0 %v2336_v54 }
 0xafa   :  { %1914 = vmatprep.subr.bf16.mxu1 %v2201_v0  ;;  %1906 = vmatprep.subr.bf16.mxu0 %v2201_v0 }
 0xbb4   :  { %v2420_v19 = vpop.f32.mrf.mxu0  ;;  %v662_v20 = vpop.f32.mrf.mxu1 }
 0xbb5   :  { %v663_v21 = vadd.f32 %v662_v20, %v2314_v38 }
 0xbb6   :  { %v1880_v22 = vpop.f32.mrf.mxu0  ;;  %v1888_v23 = vpop.f32.mrf.mxu1 }
 0xbb7   :  { %2057 = vtanh.f32 %v663_v21  ;;  %v1709_v30 = vmul.f32 -1.442695, %v663_v21 }
 0xbb8   :  { %v621_v25 = vpop.f32.mrf.mxu0  ;;  %v665_v26 = vpop.f32.mrf.mxu1 }
 0xbb9   :  { %2059 = vpow2.f32 %v1709_v30 }
 0xbba   :  { %v1881_v27 = vpop.f32.mrf.mxu0  ;;  %v1889_v28 = vpop.f32.mrf.mxu1 }
 0xbc4   :  { %v2058_v29 = vpop.eup %2057 }
 0xbc5   :  { %677 = vrot.lane.b32.xlu0 %v2058_v29, %s2199_s17 }
 0xbc6   :  { %v2060_v31 = vpop.eup %2059 }
 0xbc7   :  { %v671_v32 = vadd.f32 1.0, %v2060_v31 }
 0xbc9   :  { %2061 = vrcp.f32 %v671_v32 }
 0xbd6   :  { %v2062_v33 = vpop.eup %2061 }
 0xbd7   :  { %v675_v38 = vmul.f32 %v2062_v33, %v570_v13 }
 0xc37   :  { %v678_v36 = vpop.permute.xlu0 %677 }
 0xc38   :  { %v680_v37 = vmul.f32 %v2062_v33, %v678_v36 }
 0xc3a   :  { %682 = vrot.lane.b32.xlu1 %v680_v37, %s2204_s3 }
 0xcac   :  { %v683_v41 = vpop.permute.xlu1 %682 }
 0xcad   :  { %v685_v43 = vadd.f32 %v683_v41, %v675_v38  ;;  %v2472_v38 = vld [vmem:[#allocation5 + $0x8] sm:$0xff]  }
 0xcaf   :  { %2063 = vtanh.f32 %v685_v43 }
 0xcbc   :  { %v2064_v44 = vpop.eup %2063 }
 0xcbd   :  { %688 = vrot.lane.b32.xlu0 %v2064_v44, %s2199_s17 }
 0xd2f   :  { %v689_v45 = vpop.permute.xlu0 %688 }
 0xd30   :  { %v691_v34 = vmul.f32 %v2062_v33, %v689_v45 }
 0xd32   :  { %v692_v46 = vpack.c.bf16 %v691_v34, %v691_v34 }
 0xd34   :  { %694 = vrot.lane.b32.xlu1 %v692_v46, %s2204_s3 }
 0xda6   :  { %v695_v47 = vpop.permute.xlu1 %694 }
 0xda7   :  { %1895 = vmatmul.mubr.msk.bf16.vlgmr.msra.gmra.mxu0 %vm147_vm4, %v695_v47  ;;  %1903 = vmatmul.mubr.msk.bf16.vlgmr.msra.gmra.mxu1 %vm147_vm4, %v695_v47 }
 0xda8   :  { %1915 = vmatpush3.bf16.msra.mxu1 %v2273_v3  ;;  %1907 = vmatpush3.bf16.msra.mxu0 %v2330_v53 }
 0xda9   :  { %1916 = vmatprep.subr.bf16.mxu1 %v2201_v0  ;;  %1908 = vmatprep.subr.bf16.mxu0 %v2201_v0 }
 0xdaa   :  { %1918 = vmatprep.mubr.msk.bf16.mxu1 %vm2202_vm0, %v2201_v0  ;;  %1910 = vmatprep.mubr.msk.bf16.mxu0 %vm2202_vm0, %v2201_v0 }
 0xdac   :  { %1917 = vmatpush3.bf16.msra.mxu1 %v2285_v7  ;;  %1909 = vmatpush3.bf16.msra.mxu0 %v2336_v54 }
 0xdad   :  { %1930 = vmatprep.subr.bf16.mxu1 %v2201_v0  ;;  %1922 = vmatprep.subr.bf16.mxu0 %v2201_v0 }
 0xe67   :  { %v2441_v48 = vpop.f32.mrf.mxu0  ;;  %v777_v49 = vpop.f32.mrf.mxu1 }
 0xe68   :  { %v778_v50 = vadd.f32 %v777_v49, %v2317_v39 }
 0xe69   :  { %v1896_v51 = vpop.f32.mrf.mxu0  ;;  %v1904_v52 = vpop.f32.mrf.mxu1 }
 0xe6a   :  { %2065 = vtanh.f32 %v778_v50  ;;  %v1712_v62 = vmul.f32 -1.442695, %v778_v50 }
 0xe6b   :  { %v736_v56 = vpop.f32.mrf.mxu0  ;;  %v780_v57 = vpop.f32.mrf.mxu1 }
 0xe6c   :  { %2067 = vpow2.f32 %v1712_v62 }
 0xe6d   :  { %v1897_v58 = vpop.f32.mrf.mxu0  ;;  %v1905_v59 = vpop.f32.mrf.mxu1 }
 0xe77   :  { %v2066_v61 = vpop.eup %2065 }
 0xe78   :  { %792 = vrot.lane.b32.xlu0 %v2066_v61, %s2199_s17 }
 0xe79   :  { %v2068_v63 = vpop.eup %2067 }
 0xe7a   :  { %v786_v1 = vadd.f32 1.0, %v2068_v63 }
 0xe7c   :  { %2069 = vrcp.f32 %v786_v1 }
 0xe89   :  { %v2070_v2 = vpop.eup %2069 }
 0xe8a   :  { %v790_v39 = vmul.f32 %v2070_v2, %v685_v43  ;;  %v2477_v43 = vld [vmem:[#allocation5] sm:$0xff]  }
 0xeea   :  { %v793_v4 = vpop.permute.xlu0 %792 }
 0xeeb   :  { %v795_v5 = vmul.f32 %v2070_v2, %v793_v4 }
 0xeed   :  { %797 = vrot.lane.b32.xlu1 %v795_v5, %s2204_s3 }
 0xf5f   :  { %v798_v6 = vpop.permute.xlu1 %797 }
 0xf60   :  { %v800_v9 = vadd.f32 %v798_v6, %v790_v39 }
 0xf62   :  { %2071 = vtanh.f32 %v800_v9 }
 0xf6f   :  { %v2072_v10 = vpop.eup %2071 }
 0xf70   :  { %803 = vrot.lane.b32.xlu0 %v2072_v10, %s2199_s17 }
 0xfe2   :  { %v804_v11 = vpop.permute.xlu0 %803 }
 0xfe3   :  { %v806_v35 = vmul.f32 %v2070_v2, %v804_v11 }
 0xfe5   :  { %v807_v12 = vpack.c.bf16 %v806_v35, %v806_v35 }
 0xfe7   :  { %809 = vrot.lane.b32.xlu1 %v807_v12, %s2204_s3 }
0x1059   :  { %v810_v13 = vpop.permute.xlu1 %809 }
0x105a   :  { %1911 = vmatmul.mubr.msk.bf16.vlgmr.msra.gmra.mxu0 %vm147_vm4, %v810_v13  ;;  %1919 = vmatmul.mubr.msk.bf16.vlgmr.msra.gmra.mxu1 %vm147_vm4, %v810_v13 }
0x105b   :  { %1931 = vmatpush3.bf16.msra.mxu1 %v2273_v3  ;;  %1923 = vmatpush3.bf16.msra.mxu0 %v2330_v53 }
0x105c   :  { %1932 = vmatprep.subr.bf16.mxu1 %v2201_v0  ;;  %1924 = vmatprep.subr.bf16.mxu0 %v2201_v0 }
0x105d   :  { %1934 = vmatprep.mubr.msk.bf16.mxu1 %vm2202_vm0, %v2201_v0  ;;  %1926 = vmatprep.mubr.msk.bf16.mxu0 %vm2202_vm0, %v2201_v0 }
0x105f   :  { %1933 = vmatpush3.bf16.msra.mxu1 %v2285_v7  ;;  %1925 = vmatpush3.bf16.msra.mxu0 %v2336_v54 }
0x1060   :  { %1946 = vmatprep.subr.bf16.mxu1 %v2201_v0  ;;  %1938 = vmatprep.subr.bf16.mxu0 %v2201_v0 }
0x111a   :  { %v2462_v3 = vpop.f32.mrf.mxu0  ;;  %v892_v14 = vpop.f32.mrf.mxu1 }
0x111b   :  { %v893_v15 = vadd.f32 %v892_v14, %v2320_v40 }
0x111c   :  { %v1912_v16 = vpop.f32.mrf.mxu0  ;;  %v1920_v17 = vpop.f32.mrf.mxu1 }
0x111d   :  { %2073 = vtanh.f32 %v893_v15  ;;  %v1715_v7 = vmul.f32 -1.442695, %v893_v15 }
0x111e   :  { %v851_v18 = vpop.f32.mrf.mxu0  ;;  %v895_v20 = vpop.f32.mrf.mxu1 }
0x111f   :  { %2075 = vpow2.f32 %v1715_v7 }
0x1120   :  { %v1913_v21 = vpop.f32.mrf.mxu0  ;;  %v1921_v22 = vpop.f32.mrf.mxu1 }
0x112a   :  { %v2074_v23 = vpop.eup %2073 }
0x112b   :  { %907 = vrot.lane.b32.xlu0 %v2074_v23, %s2199_s17 }
0x112c   :  { %v2076_v25 = vpop.eup %2075 }
0x112d   :  { %v901_v26 = vadd.f32 1.0, %v2076_v25 }
0x112f   :  { %2077 = vrcp.f32 %v901_v26 }
0x113c   :  { %v2078_v27 = vpop.eup %2077 }
0x113d   :  { %v905_v40 = vmul.f32 %v2078_v27, %v800_v9 }
0x119d   :  { %v908_v28 = vpop.permute.xlu0 %907 }
0x119e   :  { %v910_v29 = vmul.f32 %v2078_v27, %v908_v28 }
0x11a0   :  { %912 = vrot.lane.b32.xlu1 %v910_v29, %s2204_s3 }
0x1212   :  { %v913_v30 = vpop.permute.xlu1 %912 }
0x1213   :  { %v2467_v31 = vadd.f32 %v913_v30, %v905_v40 }
0x1215   :  { %2079 = vtanh.f32 %v2467_v31 }
0x1222   :  { %v2080_v32 = vpop.eup %2079 }
0x1223   :  { %918 = vrot.lane.b32.xlu0 %v2080_v32, %s2199_s17 }
0x1295   :  { %v919_v33 = vpop.permute.xlu0 %918 }
0x1296   :  { %v921_v36 = vmul.f32 %v2078_v27, %v919_v33 }
0x1298   :  { %v922_v37 = vpack.c.bf16 %v921_v36, %v921_v36 }
0x129a   :  { %924 = vrot.lane.b32.xlu1 %v922_v37, %s2204_s3 }
0x130c   :  { %v925_v41 = vpop.permute.xlu1 %924 }
0x130d   :  { %1927 = vmatmul.mubr.msk.bf16.vlgmr.msra.gmra.mxu0 %vm147_vm4, %v925_v41  ;;  %1935 = vmatmul.mubr.msk.bf16.vlgmr.msra.gmra.mxu1 %vm147_vm4, %v925_v41 }
0x130e   :  { %1947 = vmatpush3.bf16.msra.mxu1 %v2472_v38  ;;  %1950 = vmatprep.mubr.msk.bf16.mxu1 %vm2202_vm0, %v2201_v0 }
0x130f   :  { %1948 = vmatprep.subr.bf16.mxu1 %v2201_v0  ;;  %1939 = vmatpush3.bf16.msra.mxu0 %v2330_v53 }
0x1310   :  { %1940 = vmatprep.subr.bf16.mxu0 %v2201_v0  ;;  %1942 = vmatprep.mubr.msk.bf16.mxu0 %vm2202_vm0, %v2201_v0 }
0x1312   :  { %1949 = vmatpush3.bf16.msra.mxu1 %v2477_v43 }
0x1313   :  { %1941 = vmatpush3.bf16.msra.mxu0 %v2336_v54  ;;  %1962 = vmatprep.subr.bf16.mxu1 %v2201_v0 }
0x1314   :  { %1954 = vmatprep.subr.bf16.mxu0 %v2201_v0 }
0x1315   :  { %1951 = vmatmul.mubr.bf16.vlgmr.msra.gmra.mxu1 %v2203_v8  ;;  %v2503_v8 = vld [vmem:[%s2617_s6] ss:$0 sm:$0xff] }
0x1316   :  { %1963 = vmatpush3.bf16.msra.mxu1 %v2472_v38  ;;  %1966 = vmatprep.mubr.msk.bf16.mxu1 %vm2202_vm0, %v2201_v0  ;;  %v275_v51 = vadd.f32 %v2503_v8, %v2357_v60 }
0x1317   :  { %1964 = vmatprep.subr.bf16.mxu1 %v2201_v0 }
0x131a   :  { %1965 = vmatpush3.bf16.msra.mxu1 %v2477_v43 }
0x131b   :  { %1978 = vmatprep.subr.bf16.mxu1 %v2201_v0 }
0x13cd   :  { %v2497_v53 = vpop.f32.mrf.mxu0  ;;  %v1007_v54 = vpop.f32.mrf.mxu1 }
0x13ce   :  { %v1008_v44 = vadd.f32 %v1007_v54, %v2323_v42 }
0x13cf   :  { %v1928_v45 = vpop.f32.mrf.mxu0  ;;  %v1936_v34 = vpop.f32.mrf.mxu1 }
0x13d0   :  { %2081 = vtanh.f32 %v1008_v44  ;;  %v1718_v62 = vmul.f32 -1.442695, %v1008_v44 }
0x13d1   :  { %v966_v46 = vpop.f32.mrf.mxu0  ;;  %v1010_v47 = vpop.f32.mrf.mxu1 }
0x13d3   :  { %v1929_v49 = vpop.f32.mrf.mxu0  ;;  %v1937_v50 = vpop.f32.mrf.mxu1 }
0x13d5   :  { %v1134_v52 = vpop.f32.mrf.mxu1 }
0x13d6   :  { %v1135_v56 = vadd.f32 %v1134_v52, %v275_v51 }
0x13d7   :  { %v1952_v57 = vpop.f32.mrf.mxu1 }
0x13d8   :  { %2083 = vtanh.f32 %v1135_v56  ;;  %v1722_v63 = vmul.f32 -1.442695, %v1135_v56 }
0x13d9   :  { %v1137_v42 = vpop.f32.mrf.mxu1  ;;  %2085 = vpow2.f32 %v1718_v62 }
0x13da   :  { %2087 = vpow2.f32 %v1722_v63 }
0x13db   :  { %v1953_v58 = vpop.f32.mrf.mxu1 }
0x13dd   :  { %v2082_v59 = vpop.eup %2081 }
0x13de   :  { %1022 = vrot.lane.b32.xlu0 %v2082_v59, %s2199_s17  ;;  %v504_v59 = vadd.f32 %v2503_v8, %v2399_v55 }
0x13e5   :  { %v2084_v61 = vpop.eup %2083 }
0x13e6   :  { %1149 = vrot.lane.b32.xlu1 %v2084_v61, %s2199_s17  ;;  %v2086_v1 = vpop.eup %2085 }
0x13e7   :  { %v1016_v2 = vadd.f32 1.0, %v2086_v1  ;;  %v2088_v60 = vpop.eup %2087 }
0x13e8   :  { %v1143_v4 = vadd.f32 1.0, %v2088_v60 }
0x13e9   :  { %2089 = vrcp.f32 %v1016_v2 }
0x13ea   :  { %2091 = vrcp.f32 %v1143_v4 }
0x13f6   :  { %v2090_v5 = vpop.eup %2089 }
0x13f7   :  { %v2092_v9 = vpop.eup %2091  ;;  %v1020_v35 = vmul.f32 %v2090_v5, %v2467_v31  ;;  %v389_v31 = vadd.f32 %v2503_v8, %v2378_v24 }
0x13f8   :  { %v1147_v14 = vmul.f32 0.0, %v2092_v9 }
0x1450   :  { %v1023_v39 = vpop.permute.xlu0 %1022 }
0x1451   :  { %v1025_v6 = vmul.f32 %v2090_v5, %v1023_v39 }
0x1453   :  { %1027 = vrot.lane.b32.xlu0 %v1025_v6, %s2204_s3 }
0x1458   :  { %v1150_v10 = vpop.permute.xlu1 %1149 }
0x1459   :  { %v1152_v11 = vmul.f32 %v2092_v9, %v1150_v10 }
0x145b   :  { %1154 = vrot.lane.b32.xlu1 %v1152_v11, %s2204_s3 }
0x14c5   :  { %v1028_v12 = vpop.permute.xlu0 %1027 }
0x14c6   :  { %v1030_v13 = vadd.f32 %v1028_v12, %v1020_v35 }
0x14c8   :  { %2093 = vtanh.f32 %v1030_v13 }
0x14cd   :  { %v1155_v15 = vpop.permute.xlu1 %1154 }
0x14ce   :  { %v1157_v16 = vadd.f32 %v1155_v15, %v1147_v14 }
0x14d0   :  { %2095 = vtanh.f32 %v1157_v16 }
0x14d5   :  { %v2094_v17 = vpop.eup %2093 }
0x14d6   :  { %1033 = vrot.lane.b32.xlu0 %v2094_v17, %s2199_s17  ;;  %v619_v17 = vadd.f32 %v2503_v8, %v2420_v19 }
0x14dd   :  { %v2096_v18 = vpop.eup %2095 }
0x14de   :  { %1160 = vrot.lane.b32.xlu1 %v2096_v18, %s2199_s17 }
0x1548   :  { %v1034_v20 = vpop.permute.xlu0 %1033 }
0x1549   :  { %v1036_v21 = vmul.f32 %v2090_v5, %v1034_v20 }
0x154b   :  { %v1037_v22 = vpack.c.bf16 %v1036_v21, %v1036_v21 }
0x154d   :  { %1039 = vrot.lane.b32.xlu0 %v1037_v22, %s2204_s3 }
0x1550   :  { %v1161_v23 = vpop.permute.xlu1 %1160 }
0x1551   :  { %v1163_v7 = vmul.f32 %v2092_v9, %v1161_v23 }
0x1553   :  { %v1164_v25 = vpack.c.bf16 %v1163_v7, %v1163_v7 }
0x1555   :  { %1166 = vrot.lane.b32.xlu1 %v1164_v25, %s2204_s3 }
0x15bf   :  { %v1040_v26 = vpop.permute.xlu0 %1039 }
0x15c0   :  { %1943 = vmatmul.mubr.msk.bf16.vlgmr.msra.gmra.mxu0 %vm147_vm4, %v1040_v26 }
0x15c1   :  { %1955 = vmatpush3.bf16.msra.mxu0 %v2472_v38  ;;  %1958 = vmatprep.mubr.msk.bf16.mxu0 %vm2202_vm0, %v2201_v0 }
0x15c2   :  { %1956 = vmatprep.subr.bf16.mxu0 %v2201_v0 }
0x15c5   :  { %1957 = vmatpush3.bf16.msra.mxu0 %v2477_v43 }
0x15c6   :  { %1970 = vmatprep.subr.bf16.mxu0 %v2201_v0 }
0x15c7   :  { %v1167_v27 = vpop.permute.xlu1 %1166 }
0x15c8   :  { %1959 = vmatmul.mubr.msk.bf16.vlgmr.msra.gmra.mxu0 %vm147_vm4, %v1167_v27 }
0x15c9   :  { %1971 = vmatpush3.bf16.msra.mxu0 %v2472_v38  ;;  %1974 = vmatprep.mubr.msk.bf16.mxu0 %vm2202_vm0, %v2201_v0 }
0x15ca   :  { %1972 = vmatprep.subr.bf16.mxu0 %v2201_v0 }
0x15cd   :  { %1973 = vmatpush3.bf16.msra.mxu0 %v2477_v43 }
0x15ce   :  { %1986 = vmatprep.subr.bf16.mxu0 %v2201_v0 }
0x1680   :  { %v2530_v28 = vpop.f32.mrf.mxu0 }
0x1682   :  { %v1944_v29 = vpop.f32.mrf.mxu0 }
0x1684   :  { %v1081_v40 = vpop.f32.mrf.mxu0 }
0x1686   :  { %v1945_v30 = vpop.f32.mrf.mxu0 }
0x1688   :  { %v1205_v32 = vpop.f32.mrf.mxu0 }
0x1689   :  { %v1206_v33 = vadd.f32 %v1205_v32, %v389_v31 }
0x168a   :  { %v1960_v36 = vpop.f32.mrf.mxu0 }
0x168b   :  { %2097 = vtanh.f32 %v1206_v33  ;;  %v1724_v44 = vmul.f32 -1.442695, %v1206_v33 }
0x168c   :  { %v1208_v37 = vpop.f32.mrf.mxu0 }
0x168d   :  { %2099 = vpow2.f32 %v1724_v44  ;;  %v734_v44 = vadd.f32 %v2503_v8, %v2441_v48 }
0x168e   :  { %v1961_v41 = vpop.f32.mrf.mxu0 }
0x1698   :  { %v2098_v54 = vpop.eup %2097 }
0x1699   :  { %1220 = vrot.lane.b32.xlu0 %v2098_v54, %s2199_s17 }
0x169a   :  { %v2100_v45 = vpop.eup %2099 }
0x169b   :  { %v1214_v34 = vadd.f32 1.0, %v2100_v45 }
0x169d   :  { %2101 = vrcp.f32 %v1214_v34 }
0x16aa   :  { %v2102_v46 = vpop.eup %2101 }
0x16ab   :  { %v1218_v24 = vmul.f32 %v2102_v46, %v1157_v16 }
0x170b   :  { %v1221_v47 = vpop.permute.xlu0 %1220 }
0x170c   :  { %v1223_v49 = vmul.f32 %v2102_v46, %v1221_v47 }
0x170e   :  { %1225 = vrot.lane.b32.xlu1 %v1223_v49, %s2204_s3 }
0x1780   :  { %v1226_v50 = vpop.permute.xlu1 %1225 }
0x1781   :  { %v1228_v51 = vadd.f32 %v1226_v50, %v1218_v24 }
0x1783   :  { %2103 = vtanh.f32 %v1228_v51 }
0x1790   :  { %v2104_v52 = vpop.eup %2103 }
0x1791   :  { %1231 = vrot.lane.b32.xlu0 %v2104_v52, %s2199_s17 }
0x1803   :  { %v1232_v56 = vpop.permute.xlu0 %1231 }
0x1804   :  { %v1234_v57 = vmul.f32 %v2102_v46, %v1232_v56 }
0x1806   :  { %v1235_v42 = vpack.c.bf16 %v1234_v57, %v1234_v57 }
0x1808   :  { %1237 = vrot.lane.b32.xlu1 %v1235_v42, %s2204_s3 }
0x187a   :  { %v1238_v58 = vpop.permute.xlu1 %1237 }
0x187b   :  { %1967 = vmatmul.mubr.msk.bf16.vlgmr.msra.gmra.mxu1 %vm147_vm4, %v1238_v58 }
0x187c   :  { %1979 = vmatpush3.bf16.msra.mxu1 %v2472_v38  ;;  %1982 = vmatprep.mubr.msk.bf16.mxu1 %vm2202_vm0, %v2201_v0 }
0x187d   :  { %1980 = vmatprep.subr.bf16.mxu1 %v2201_v0 }
0x1880   :  { %1981 = vmatpush3.bf16.msra.mxu1 %v2477_v43 }
0x1881   :  { %1994 = vmatprep.subr.bf16.mxu1 %v2201_v0 }
0x193b   :  { %v1276_v61 = vpop.f32.mrf.mxu1 }
0x193c   :  { %v1277_v62 = vadd.f32 %v1276_v61, %v504_v59 }
0x193d   :  { %v1968_v63 = vpop.f32.mrf.mxu1 }
0x193e   :  { %2105 = vtanh.f32 %v1277_v62  ;;  %v1726_v4 = vmul.f32 -1.442695, %v1277_v62 }
0x193f   :  { %v1279_v1 = vpop.f32.mrf.mxu1 }
0x1940   :  { %2107 = vpow2.f32 %v1726_v4 }
0x1941   :  { %v1969_v2 = vpop.f32.mrf.mxu1 }
0x194b   :  { %v2106_v60 = vpop.eup %2105 }
0x194c   :  { %1291 = vrot.lane.b32.xlu0 %v2106_v60, %s2199_s17  ;;  %v849_v60 = vadd.f32 %v2503_v8, %v2462_v3 }
0x194d   :  { %v2108_v5 = vpop.eup %2107 }
0x194e   :  { %v1285_v39 = vadd.f32 1.0, %v2108_v5 }
0x1950   :  { %2109 = vrcp.f32 %v1285_v39 }
0x195d   :  { %v2110_v6 = vpop.eup %2109 }
0x195e   :  { %v1289_v55 = vmul.f32 %v2110_v6, %v1228_v51 }
0x19be   :  { %v1292_v9 = vpop.permute.xlu0 %1291 }
0x19bf   :  { %v1294_v10 = vmul.f32 %v2110_v6, %v1292_v9 }
0x19c1   :  { %1296 = vrot.lane.b32.xlu1 %v1294_v10, %s2204_s3 }
0x1a33   :  { %v1297_v11 = vpop.permute.xlu1 %1296 }
0x1a34   :  { %v1299_v35 = vadd.f32 %v1297_v11, %v1289_v55 }
0x1a36   :  { %2111 = vtanh.f32 %v1299_v35 }
0x1a43   :  { %v2112_v12 = vpop.eup %2111 }
0x1a44   :  { %1302 = vrot.lane.b32.xlu0 %v2112_v12, %s2199_s17 }
0x1ab6   :  { %v1303_v13 = vpop.permute.xlu0 %1302 }
0x1ab7   :  { %v1305_v14 = vmul.f32 %v2110_v6, %v1303_v13 }
0x1ab9   :  { %v1306_v15 = vpack.c.bf16 %v1305_v14, %v1305_v14 }
0x1abb   :  { %1308 = vrot.lane.b32.xlu1 %v1306_v15, %s2204_s3 }
0x1b2d   :  { %v1309_v16 = vpop.permute.xlu1 %1308 }
0x1b2e   :  { %1975 = vmatmul.mubr.msk.bf16.vlgmr.msra.gmra.mxu0 %vm147_vm4, %v1309_v16 }
0x1b2f   :  { %1987 = vmatpush3.bf16.msra.mxu0 %v2472_v38  ;;  %1990 = vmatprep.mubr.msk.bf16.mxu0 %vm2202_vm0, %v2201_v0 }
0x1b30   :  { %1988 = vmatprep.subr.bf16.mxu0 %v2201_v0 }
0x1b33   :  { %1989 = vmatpush3.bf16.msra.mxu0 %v2477_v43 }
0x1b34   :  { %2002 = vmatprep.subr.bf16.mxu0 %v2201_v0 }
0x1bee   :  { %v1347_v18 = vpop.f32.mrf.mxu0 }
0x1bef   :  { %v1348_v20 = vadd.f32 %v1347_v18, %v619_v17 }
0x1bf0   :  { %v1976_v21 = vpop.f32.mrf.mxu0 }
0x1bf1   :  { %2113 = vtanh.f32 %v1348_v20  ;;  %v1728_v25 = vmul.f32 -1.442695, %v1348_v20  ;;  %v964_v20 = vadd.f32 %v2503_v8, %v2497_v53 }
0x1bf2   :  { %v1350_v22 = vpop.f32.mrf.mxu0 }
0x1bf3   :  { %2115 = vpow2.f32 %v1728_v25 }
0x1bf4   :  { %v1977_v23 = vpop.f32.mrf.mxu0 }
0x1bfe   :  { %v2114_v7 = vpop.eup %2113 }
0x1bff   :  { %1362 = vrot.lane.b32.xlu0 %v2114_v7, %s2199_s17 }
0x1c00   :  { %v2116_v26 = vpop.eup %2115 }
0x1c01   :  { %v1356_v27 = vadd.f32 1.0, %v2116_v26 }
0x1c03   :  { %2117 = vrcp.f32 %v1356_v27 }
0x1c10   :  { %v2118_v29 = vpop.eup %2117 }
0x1c11   :  { %v1360_v19 = vmul.f32 %v2118_v29, %v1299_v35 }
0x1c71   :  { %v1363_v40 = vpop.permute.xlu0 %1362 }
0x1c72   :  { %v1365_v30 = vmul.f32 %v2118_v29, %v1363_v40 }
0x1c74   :  { %1367 = vrot.lane.b32.xlu1 %v1365_v30, %s2204_s3 }
0x1ce6   :  { %v1368_v31 = vpop.permute.xlu1 %1367 }
0x1ce7   :  { %v1370_v32 = vadd.f32 %v1368_v31, %v1360_v19 }
0x1ce9   :  { %2119 = vtanh.f32 %v1370_v32 }
0x1cf6   :  { %v2120_v33 = vpop.eup %2119 }
0x1cf7   :  { %1373 = vrot.lane.b32.xlu0 %v2120_v33, %s2199_s17 }
0x1d69   :  { %v1374_v36 = vpop.permute.xlu0 %1373 }
0x1d6a   :  { %v1376_v37 = vmul.f32 %v2118_v29, %v1374_v36 }
0x1d6c   :  { %v1377_v41 = vpack.c.bf16 %v1376_v37, %v1376_v37 }
0x1d6e   :  { %1379 = vrot.lane.b32.xlu1 %v1377_v41, %s2204_s3 }
0x1de0   :  { %v1380_v54 = vpop.permute.xlu1 %1379 }
0x1de1   :  { %1983 = vmatmul.mubr.msk.bf16.vlgmr.msra.gmra.mxu1 %vm147_vm4, %v1380_v54 }
0x1de2   :  { %1995 = vmatpush3.bf16.msra.mxu1 %v2472_v38  ;;  %1998 = vmatprep.mubr.msk.bf16.mxu1 %vm2202_vm0, %v2201_v0 }
0x1de3   :  { %1996 = vmatprep.subr.bf16.mxu1 %v2201_v0 }
0x1de6   :  { %1997 = vmatpush3.bf16.msra.mxu1 %v2477_v43 }
0x1ea1   :  { %v1418_v45 = vpop.f32.mrf.mxu1 }
0x1ea2   :  { %v1419_v34 = vadd.f32 %v1418_v45, %v734_v44  ;;  %v1079_v45 = vadd.f32 %v2503_v8, %v2530_v28  ;;  %v1737_v8 = vld [vmem:[%s2618_s7] ss:$0 sm:$0xff] }
0x1ea3   :  { %v1984_v46 = vpop.f32.mrf.mxu1 }
0x1ea4   :  { %2121 = vtanh.f32 %v1419_v34  ;;  %v1730_v50 = vmul.f32 -1.442695, %v1419_v34 }
0x1ea5   :  { %v1421_v47 = vpop.f32.mrf.mxu1 }
0x1ea6   :  { %2123 = vpow2.f32 %v1730_v50 }
0x1ea7   :  { %v1985_v49 = vpop.f32.mrf.mxu1 }
0x1eb1   :  { %v2122_v24 = vpop.eup %2121 }
0x1eb2   :  { %1433 = vrot.lane.b32.xlu0 %v2122_v24, %s2199_s17 }
0x1eb3   :  { %v2124_v51 = vpop.eup %2123 }
0x1eb4   :  { %v1427_v52 = vadd.f32 1.0, %v2124_v51 }
0x1eb6   :  { %2125 = vrcp.f32 %v1427_v52 }
0x1ec3   :  { %v2126_v56 = vpop.eup %2125 }
0x1ec4   :  { %v1431_v48 = vmul.f32 %v2126_v56, %v1370_v32 }
0x1f24   :  { %v1434_v57 = vpop.permute.xlu0 %1433 }
0x1f25   :  { %v1436_v42 = vmul.f32 %v2126_v56, %v1434_v57 }
0x1f27   :  { %1438 = vrot.lane.b32.xlu1 %v1436_v42, %s2204_s3 }
0x1f99   :  { %v1439_v58 = vpop.permute.xlu1 %1438 }
0x1f9a   :  { %v1441_v59 = vadd.f32 %v1439_v58, %v1431_v48 }
0x1f9c   :  { %2127 = vtanh.f32 %v1441_v59 }
0x1fa9   :  { %v2128_v61 = vpop.eup %2127 }
0x1faa   :  { %1444 = vrot.lane.b32.xlu0 %v2128_v61, %s2199_s17 }
0x201c   :  { %v1445_v62 = vpop.permute.xlu0 %1444 }
0x201d   :  { %v1447_v63 = vmul.f32 %v2126_v56, %v1445_v62 }
0x201f   :  { %v1448_v1 = vpack.c.bf16 %v1447_v63, %v1447_v63 }
0x2021   :  { %1450 = vrot.lane.b32.xlu1 %v1448_v1, %s2204_s3 }
0x2093   :  { %v1451_v2 = vpop.permute.xlu1 %1450 }
0x2094   :  { %1991 = vmatmul.mubr.msk.bf16.vlgmr.msra.gmra.mxu0 %vm147_vm4, %v1451_v2 }
0x2095   :  { %2003 = vmatpush3.bf16.msra.mxu0 %v2472_v38  ;;  %2006 = vmatprep.mubr.msk.bf16.mxu0 %vm2202_vm0, %v2201_v0 }
0x2096   :  { %2004 = vmatprep.subr.bf16.mxu0 %v2201_v0 }
0x2099   :  { %2005 = vmatpush3.bf16.msra.mxu0 %v2477_v43 }
0x2154   :  { %v1489_v4 = vpop.f32.mrf.mxu0 }
0x2155   :  { %v1490_v5 = vadd.f32 %v1489_v4, %v849_v60 }
0x2156   :  { %v1992_v39 = vpop.f32.mrf.mxu0 }
0x2157   :  { %2129 = vtanh.f32 %v1490_v5  ;;  %v1732_v38 = vmul.f32 -1.442695, %v1490_v5  ;;  %v1680_v5 = vstv %s2619_s8 }
0x2158   :  { %v1492_v6 = vpop.f32.mrf.mxu0 }
0x2159   :  { %2131 = vpow2.f32 %v1732_v38 }
0x215a   :  { %v1993_v9 = vpop.f32.mrf.mxu0 }
0x2164   :  { %v2130_v10 = vpop.eup %2129 }
0x2165   :  { %1504 = vrot.lane.b32.xlu0 %v2130_v10, %s2199_s17 }
0x2166   :  { %v2132_v55 = vpop.eup %2131 }
0x2167   :  { %v1498_v11 = vadd.f32 1.0, %v2132_v55 }
0x2169   :  { %2133 = vrcp.f32 %v1498_v11 }
0x2176   :  { %v2134_v0 = vpop.eup %2133 }
0x2177   :  { %v1502_v3 = vmul.f32 %v2134_v0, %v1441_v59 }
0x21d7   :  { %v1505_v35 = vpop.permute.xlu0 %1504 }
0x21d8   :  { %v1507_v43 = vmul.f32 %v2134_v0, %v1505_v35 }
0x21da   :  { %1509 = vrot.lane.b32.xlu1 %v1507_v43, %s2204_s3 }
0x224c   :  { %v1510_v12 = vpop.permute.xlu1 %1509 }
0x224d   :  { %v1512_v13 = vadd.f32 %v1510_v12, %v1502_v3 }
0x224f   :  { %2135 = vtanh.f32 %v1512_v13 }
0x225c   :  { %v2136_v14 = vpop.eup %2135 }
0x225d   :  { %1515 = vrot.lane.b32.xlu0 %v2136_v14, %s2199_s17 }
0x22cf   :  { %v1516_v15 = vpop.permute.xlu0 %1515 }
0x22d0   :  { %v1518_v16 = vmul.f32 %v2134_v0, %v1516_v15 }
0x22d2   :  { %v1519_v17 = vpack.c.bf16 %v1518_v16, %v1518_v16 }
0x22d4   :  { %1521 = vrot.lane.b32.xlu1 %v1519_v17, %s2204_s3 }
0x2346   :  { %v1522_v18 = vpop.permute.xlu1 %1521 }
0x2347   :  { %1999 = vmatmul.mubr.msk.bf16.vlgmr.msra.gmra.mxu1 %vm147_vm4, %v1522_v18 }
0x2407   :  { %v1560_v21 = vpop.f32.mrf.mxu1 }
0x2408   :  { %v1561_v22 = vadd.f32 %v1560_v21, %v964_v20 }
0x2409   :  { %v2000_v23 = vpop.f32.mrf.mxu1 }
0x240a   :  { %2137 = vtanh.f32 %v1561_v22  ;;  %v1734_v27 = vmul.f32 -1.442695, %v1561_v22 }
0x240b   :  { %v1563_v7 = vpop.f32.mrf.mxu1 }
0x240c   :  { %2139 = vpow2.f32 %v1734_v27 }
0x240d   :  { %v2001_v25 = vpop.f32.mrf.mxu1 }
0x2417   :  { %v2138_v26 = vpop.eup %2137 }
0x2418   :  { %1575 = vrot.lane.b32.xlu0 %v2138_v26, %s2199_s17 }
0x2419   :  { %v2140_v29 = vpop.eup %2139 }
0x241a   :  { %v1569_v40 = vadd.f32 1.0, %v2140_v29 }
0x241c   :  { %2141 = vrcp.f32 %v1569_v40 }
0x2429   :  { %v2142_v30 = vpop.eup %2141 }
0x242a   :  { %v1573_v53 = vmul.f32 %v2142_v30, %v1512_v13 }
0x248a   :  { %v1576_v19 = vpop.permute.xlu0 %1575 }
0x248b   :  { %v1578_v31 = vmul.f32 %v2142_v30, %v1576_v19 }
0x248d   :  { %1580 = vrot.lane.b32.xlu1 %v1578_v31, %s2204_s3 }
0x24ff   :  { %v1581_v32 = vpop.permute.xlu1 %1580 }
0x2500   :  { %v1583_v33 = vadd.f32 %v1581_v32, %v1573_v53 }
0x2502   :  { %2143 = vtanh.f32 %v1583_v33 }
0x250f   :  { %v2144_v36 = vpop.eup %2143 }
0x2510   :  { %1586 = vrot.lane.b32.xlu0 %v2144_v36, %s2199_s17 }
0x2582   :  { %v1587_v37 = vpop.permute.xlu0 %1586 }
0x2583   :  { %v1589_v41 = vmul.f32 %v2142_v30, %v1587_v37 }
0x2585   :  { %v1590_v54 = vpack.c.bf16 %v1589_v41, %v1589_v41 }
0x2587   :  { %1592 = vrot.lane.b32.xlu1 %v1590_v54, %s2204_s3 }
0x25f9   :  { %v1593_v44 = vpop.permute.xlu1 %1592 }
0x25fa   :  { %2007 = vmatmul.mubr.msk.bf16.vlgmr.msra.gmra.mxu0 %vm147_vm4, %v1593_v44 }
0x26ba   :  { %v1631_v34 = vpop.f32.mrf.mxu0 }
0x26bb   :  { %v1632_v46 = vadd.f32 %v1631_v34, %v1079_v45 }
0x26bc   :  { %v2008_v47 = vpop.f32.mrf.mxu0 }
0x26bd   :  { %2145 = vtanh.f32 %v1632_v46  ;;  %v1736_v51 = vmul.f32 -1.442695, %v1632_v46 }
0x26be   :  { %v1634_v49 = vpop.f32.mrf.mxu0 }
0x26bf   :  { %2147 = vpow2.f32 %v1736_v51 }
0x26c0   :  { %v2009_v24 = vpop.f32.mrf.mxu0 }
0x26ca   :  { %v2146_v50 = vpop.eup %2145 }
0x26cb   :  { %1646 = vrot.lane.b32.xlu0 %v2146_v50, %s2199_s17 }
0x26cc   :  { %v2148_v52 = vpop.eup %2147 }
0x26cd   :  { %v1640_v56 = vadd.f32 1.0, %v2148_v52 }
0x26cf   :  { %2149 = vrcp.f32 %v1640_v56 }
0x26dc   :  { %v2150_v57 = vpop.eup %2149 }
0x26dd   :  { %v1644_v28 = vmul.f32 %v2150_v57, %v1583_v33 }
0x273d   :  { %v1647_v42 = vpop.permute.xlu0 %1646 }
0x273e   :  { %v1649_v48 = vmul.f32 %v2150_v57, %v1647_v42 }
0x2740   :  { %1651 = vrot.lane.b32.xlu1 %v1649_v48, %s2204_s3 }
0x2744   :  { %1667 = vrot.lane.b32.xlu1 %v1737_v8, %s2205_s12 }
0x27b2   :  { %v1652_v58 = vpop.permute.xlu1 %1651 }
0x27b3   :  { %v1654_v59 = vadd.f32 %v1652_v58, %v1644_v28 }
0x27b5   :  { %2151 = vtanh.f32 %v1654_v59 }
0x27b6   :  { %v1668_v63 = vpop.permute.xlu1 %1667 }
0x27c2   :  { %v2152_v61 = vpop.eup %2151 }
0x27c3   :  { %1657 = vrot.lane.b32.xlu0 %v2152_v61, %s2199_s17 }
0x2835   :  { %v1658_v62 = vpop.permute.xlu0 %1657 }
0x2836   :  { %v1660_v1 = vmul.f32 %v2150_v57, %v1658_v62 }
0x2838   :  { %v1670_v2 = vmul.f32 %v1668_v63, %v1660_v1 }
0x283a   :  { %1672 = vrot.lane.b32.xlu0 %v1670_v2, %s2204_s3 }
0x28ac   :  { %v1673_v60 = vpop.permute.xlu0 %1672 }
0x28ad   :  { %v1676_v4 = vsel %vm1675_vm5, %v1673_v60, 0.0 }
0x28ae   :  { %1677 = vadd.xlane.f32.xlu1 %v1676_v4 }
0x2937   :  { %v1678_v39 = vpop.xlane.xlu1 %1677 }
0x2938   :  { %v1681_v6 = vadd.f32 %v1680_v5, %v1678_v39 }
0x293a   :  { %1683 = vst.msk [vmem:[%s2620_s9] sm:$0x3] %vm1682_vm6, %v1681_v6 }
0x293b   :  { %1688 = vsyncpa [#allocation4], 1 }
0x293c   :  { %1689 = vsyncpa [#allocation6], 1 }

</bundles_post_ra>
